<compile_context>
chip_gen: v7x
topology: tpu7x:2x2x1
jax: 0.10.0
libtpu: 0.0.40
codegen_flags: <defaults>
</compile_context>

<pallas_src>
import functools

import jax
import jax.numpy as jnp
from jax import lax
from jax.experimental import pallas as pl
from jax.experimental.pallas import tpu as pltpu

_VMEM_LIMIT = 32 * 1024 * 1024  # explicit scoped-VMEM budget; leaves headroom on v7x (64 MiB)


def _pick_row_tile(n):
    for t in (1024, 512, 256, 128, 64, 32, 16, 8):
        if n % t == 0:
            return t
    return n  # falls back to "equal to full dim", which is always legal


def _pick_time_chunk(t, cap=64):
    best = 1
    for c in range(1, min(t, cap) + 1):
        if t % c == 0:
            best = c
    return best


# ---------------------------------------------------------------------------
# Kernel 1: input-side gate precompute, both directions fused.
#   GI_f = X @ W_ih_f^T + b_ih_f ;  GI_b = X @ W_ih_b^T + b_ih_b
# One big row-tiled GEMM over all (T*B) rows instead of T tiny matmuls inside
# the serial recurrence.
# ---------------------------------------------------------------------------
def _input_gates_kernel(x_ref, wf_ref, wb_ref, bf_ref, bb_ref, gif_ref, gib_ref):
    x = x_ref[...]
    gif_ref[...] = jnp.dot(x, wf_ref[...], preferred_element_type=jnp.float32) + bf_ref[...]
    gib_ref[...] = jnp.dot(x, wb_ref[...], preferred_element_type=jnp.float32) + bb_ref[...]


def input_gates(x_flat, wihT_f, wihT_b, bih_f, bih_b):
    n, d = x_flat.shape
    h3 = wihT_f.shape[1]
    r = _pick_row_tile(n)
    return pl.pallas_call(
        _input_gates_kernel,
        out_shape=(jax.ShapeDtypeStruct((n, h3), jnp.float32),
                   jax.ShapeDtypeStruct((n, h3), jnp.float32)),
        grid=(n // r,),
        in_specs=[pl.BlockSpec((r, d), lambda i: (i, 0)),
                  pl.BlockSpec((d, h3), lambda i: (0, 0)),
                  pl.BlockSpec((d, h3), lambda i: (0, 0)),
                  pl.BlockSpec((1, h3), lambda i: (0, 0)),
                  pl.BlockSpec((1, h3), lambda i: (0, 0))],
        out_specs=(pl.BlockSpec((r, h3), lambda i: (i, 0)),
                   pl.BlockSpec((r, h3), lambda i: (i, 0))),
        compiler_params=pltpu.CompilerParams(
            dimension_semantics=("parallel",),
            vmem_limit_bytes=_VMEM_LIMIT),
    )(x_flat, wihT_f, wihT_b, bih_f, bih_b)


# ---------------------------------------------------------------------------
# Kernel 2: fused bidirectional GRU recurrence over a time-chunked grid.
# Grid step i consumes forward chunk i and backward chunk (nC-1-i); hidden
# states are carried in VMEM scratch across grid steps; the inner time loop
# over the chunk is unrolled.
# ---------------------------------------------------------------------------
def _bigru_kernel(gif_ref, gib_ref, len_ref, whhf_ref, whhb_ref, bhhf_ref, bhhb_ref,
                  outf_ref, outb_ref, hf_out, hb_out, hf_scr, hb_scr,
                  *, T, Tc, H, unroll):
    ci = pl.program_id(0)

    @pl.when(ci == 0)
    def _():
        hf_scr[...] = jnp.zeros_like(hf_scr)
        hb_scr[...] = jnp.zeros_like(hb_scr)

    lens = len_ref[...]  # (B, 1) int32

    def gru_update(gi, gh, h):
        # PyTorch GRU gate order: [r, z, n]
        r = jax.nn.sigmoid(gi[:, 0:H] + gh[:, 0:H])
        z = jax.nn.sigmoid(gi[:, H:2 * H] + gh[:, H:2 * H])
        n = jnp.tanh(gi[:, 2 * H:3 * H] + r * gh[:, 2 * H:3 * H])
        return (1.0 - z) * n + z * h

    def step(j, carry):
        # ---- forward direction: global time tf = ci*Tc + j -------------------
        tf = ci * Tc + j
        hf = hf_scr[...]
        ghf = jnp.dot(hf, whhf_ref[...], preferred_element_type=jnp.float32) + bhhf_ref[...]
        hf_new = gru_update(gif_ref[j], ghf, hf)
        vf = tf < lens
        hf_upd = jnp.where(vf, hf_new, hf)        # freeze past length (packed-seq semantics)
        hf_scr[...] = hf_upd
        outf_ref[j] = jnp.where(vf, hf_upd, 0.0)  # pad_packed: zeros past length

        # ---- backward direction: global time tb = T-1-(ci*Tc+j) --------------
        jb = Tc - 1 - j                           # local index inside the reversed chunk
        tb = T - 1 - (ci * Tc + j)
        hb = hb_scr[...]
        ghb = jnp.dot(hb, whhb_ref[...], preferred_element_type=jnp.float32) + bhhb_ref[...]
        hb_new = gru_update(gib_ref[jb], ghb, hb)
        vb = tb < lens
        hb_upd = jnp.where(vb, hb_new, hb)
        hb_scr[...] = hb_upd
        outb_ref[jb] = jnp.where(vb, hb_upd, 0.0)
        return carry

    lax.fori_loop(0, Tc, step, 0, unroll=unroll)

    # final hidden states (resident outputs; last grid step's value is what lands in HBM)
    hf_out[...] = hf_scr[...]
    hb_out[...] = hb_scr[...]


def bigru(gi_f, gi_b, lengths, whhT_f, whhT_b, bhh_f, bhh_b, *, time_chunk):
    T, B, H3 = gi_f.shape
    H = H3 // 3
    Tc = time_chunk
    nC = T // Tc
    unroll = Tc if Tc <= 8 else 4
    kernel = functools.partial(_bigru_kernel, T=T, Tc=Tc, H=H, unroll=unroll)

    whole2d = lambda shape: pl.BlockSpec(shape, lambda i: (0, 0))
    in_specs = [
        pl.BlockSpec((Tc, B, H3), lambda i: (i, 0, 0)),           # gi_f chunk (forward order)
        pl.BlockSpec((Tc, B, H3), lambda i: (nC - 1 - i, 0, 0)),  # gi_b chunk (reverse order)
        whole2d((B, 1)),                                          # lengths
        whole2d((H, H3)), whole2d((H, H3)),                       # W_hh (transposed)
        whole2d((1, H3)), whole2d((1, H3)),                       # b_hh
    ]
    out_specs = (
        pl.BlockSpec((Tc, B, H), lambda i: (i, 0, 0)),            # out_f chunk
        pl.BlockSpec((Tc, B, H), lambda i: (nC - 1 - i, 0, 0)),   # out_b chunk
        whole2d((B, H)), whole2d((B, H)),                         # final hidden states
    )
    return pl.pallas_call(
        kernel,
        out_shape=(jax.ShapeDtypeStruct((T, B, H), jnp.float32),
                   jax.ShapeDtypeStruct((T, B, H), jnp.float32),
                   jax.ShapeDtypeStruct((B, H), jnp.float32),
                   jax.ShapeDtypeStruct((B, H), jnp.float32)),
        grid=(nC,),
        in_specs=in_specs,
        out_specs=out_specs,
        scratch_shapes=[pltpu.VMEM((B, H), jnp.float32),
                        pltpu.VMEM((B, H), jnp.float32)],
        compiler_params=pltpu.CompilerParams(
            dimension_semantics=("arbitrary",),   # serial carry of hidden state across chunks
            vmem_limit_bytes=_VMEM_LIMIT),
    )(gi_f, gi_b, lengths.reshape(B, 1).astype(jnp.int32),
      whhT_f, whhT_b, bhh_f, bhh_b)


# ---------------------------------------------------------------------------
# Kernel 3: bias-free Linear + ReLU (compress_output / compress_hn_bi),
# row-tiled with resident weights.
# ---------------------------------------------------------------------------
def _linear_relu_kernel(x_ref, w_ref, o_ref):
    o_ref[...] = jnp.maximum(
        jnp.dot(x_ref[...], w_ref[...], preferred_element_type=jnp.float32), 0.0)


def linear_relu(x2d, wT):
    n, fin = x2d.shape
    fout = wT.shape[1]
    r = _pick_row_tile(n)
    return pl.pallas_call(
        _linear_relu_kernel,
        out_shape=jax.ShapeDtypeStruct((n, fout), jnp.float32),
        grid=(n // r,),
        in_specs=[pl.BlockSpec((r, fin), lambda i: (i, 0)),
                  pl.BlockSpec((fin, fout), lambda i: (0, 0))],
        out_specs=pl.BlockSpec((r, fout), lambda i: (i, 0)),
        compiler_params=pltpu.CompilerParams(
            dimension_semantics=("parallel",),
            vmem_limit_bytes=_VMEM_LIMIT),
    )(x2d, wT)


# ---------------------------------------------------------------------------
# Params (PyTorch layouts) + one-time prep (pre-transposed / reshaped weights).
# ---------------------------------------------------------------------------
def init_params(key, H):
    ks = jax.random.split(key, 10)
    s = 0.1
    return {
        "w_ih_f": s * jax.random.normal(ks[0], (3 * H, H), jnp.float32),
        "w_hh_f": s * jax.random.normal(ks[1], (3 * H, H), jnp.float32),
        "b_ih_f": s * jax.random.normal(ks[2], (3 * H,), jnp.float32),
        "b_hh_f": s * jax.random.normal(ks[3], (3 * H,), jnp.float32),
        "w_ih_b": s * jax.random.normal(ks[4], (3 * H, H), jnp.float32),
        "w_hh_b": s * jax.random.normal(ks[5], (3 * H, H), jnp.float32),
        "b_ih_b": s * jax.random.normal(ks[6], (3 * H,), jnp.float32),
        "b_hh_b": s * jax.random.normal(ks[7], (3 * H,), jnp.float32),
        "w_compress_output": s * jax.random.normal(ks[8], (H, 2 * H), jnp.float32),
        "w_compress_hn_bi": s * jax.random.normal(ks[9], (H, 2 * H), jnp.float32),
    }


def prepare_params(params):
    H = params["w_hh_f"].shape[1]
    return {
        "wihT_f": jnp.transpose(params["w_ih_f"]),   # (D, 3H)
        "wihT_b": jnp.transpose(params["w_ih_b"]),
        "whhT_f": jnp.transpose(params["w_hh_f"]),   # (H, 3H)
        "whhT_b": jnp.transpose(params["w_hh_b"]),
        "bih_f": params["b_ih_f"].reshape(1, 3 * H),
        "bih_b": params["b_ih_b"].reshape(1, 3 * H),
        "bhh_f": params["b_hh_f"].reshape(1, 3 * H),
        "bhh_b": params["b_hh_b"].reshape(1, 3 * H),
        "wcoT": jnp.transpose(params["w_compress_output"]),  # (2H, H)
        "wchT": jnp.transpose(params["w_compress_hn_bi"]),   # (2H, H)
    }


# ---------------------------------------------------------------------------
# Full forward (matches SentenceEncoderRNN.forward with n_layers=1, bidirectional=True).
# ---------------------------------------------------------------------------
@functools.partial(jax.jit, static_argnames=("time_chunk",))
def sentence_encoder_rnn_forward(prepped, input_var, input_lengths, *, time_chunk=None):
    B, T, D = input_var.shape
    H = prepped["whhT_f"].shape[0]

    # pad batch to a multiple of 8 sublanes; padded rows have length 0 (stay at h=0)
    Bp = ((B + 7) // 8) * 8
    if Bp != B:
        x = jnp.pad(input_var, ((0, Bp - B), (0, 0), (0, 0)))
        lens = jnp.pad(input_lengths.astype(jnp.int32), (0, Bp - B))
    else:
        x = input_var
        lens = input_lengths.astype(jnp.int32)

    x_tm = jnp.transpose(x, (1, 0, 2))  # (T, Bp, D) time-major

    # big fused GEMM for all input-side gates, both directions
    gi_f, gi_b = input_gates(x_tm.reshape(T * Bp, D),
                             prepped["wihT_f"], prepped["wihT_b"],
                             prepped["bih_f"], prepped["bih_b"])
    gi_f = gi_f.reshape(T, Bp, 3 * H)
    gi_b = gi_b.reshape(T, Bp, 3 * H)

    tc = time_chunk or _pick_time_chunk(T)
    assert T % tc == 0

    out_f, out_b, h_f, h_b = bigru(gi_f, gi_b, lens,
                                   prepped["whhT_f"], prepped["whhT_b"],
                                   prepped["bhh_f"], prepped["bhh_b"],
                                   time_chunk=tc)

    # drop batch padding
    out_f, out_b = out_f[:, :B], out_b[:, :B]
    h_f, h_b = h_f[:B], h_b[:B]

    # bidirectional GRU output (time-major), then compression on time-major rows
    bi_tm = jnp.concatenate([out_f, out_b], axis=-1)                     # (T, B, 2H)
    out_c = linear_relu(bi_tm.reshape(T * B, 2 * H), prepped["wcoT"]).reshape(T, B, H)
    output = jnp.transpose(out_c, (1, 0, 2))                             # (B, T, H)
    bi_hidden = jnp.transpose(bi_tm, (1, 0, 2))                          # (B, T, 2H)

    # hidden (2,B,H) -> transpose(0,1).view(B,2H) == concat([h_fwd, h_bwd], -1)
    hidden = linear_relu(jnp.concatenate([h_f, h_b], axis=-1), prepped["wchT"])  # (B, H)

    # TODO(synk): nn.Dropout layers are identity here (p=0 by default / eval mode).
    return output, hidden, bi_hidden


# ---------------------------------------------------------------------------
# Pure-JAX reference (for a correctness self-check only)
# ---------------------------------------------------------------------------
def _reference_forward(params, input_var, input_lengths):
    B, T, D = input_var.shape
    H = params["w_hh_f"].shape[1]
    x_tm = jnp.transpose(input_var, (1, 0, 2))
    lens = input_lengths.astype(jnp.int32)[:, None]

    def run(wih, whh, bih, bhh, reverse):
        def cell(h, inp):
            x_t, t = inp
            gi = x_t @ wih.T + bih
            gh = h @ whh.T + bhh
            r = jax.nn.sigmoid(gi[:, :H] + gh[:, :H])
            z = jax.nn.sigmoid(gi[:, H:2 * H] + gh[:, H:2 * H])
            n = jnp.tanh(gi[:, 2 * H:] + r * gh[:, 2 * H:])
            h_new = (1.0 - z) * n + z * h
            valid = t < lens
            h_upd = jnp.where(valid, h_new, h)
            return h_upd, jnp.where(valid, h_upd, 0.0)

        ts = jnp.arange(T)
        xs = (x_tm[::-1], ts[::-1]) if reverse else (x_tm, ts)
        hT, outs = lax.scan(cell, jnp.zeros((B, H), jnp.float32), xs)
        if reverse:
            outs = outs[::-1]
        return outs, hT

    of, hf = run(params["w_ih_f"], params["w_hh_f"], params["b_ih_f"], params["b_hh_f"], False)
    ob, hb = run(params["w_ih_b"], params["w_hh_b"], params["b_ih_b"], params["b_hh_b"], True)
    bi_tm = jnp.concatenate([of, ob], axis=-1)
    bi_hidden = jnp.transpose(bi_tm, (1, 0, 2))
    out = jnp.maximum(bi_hidden @ params["w_compress_output"].T, 0.0)
    hid = jnp.maximum(jnp.concatenate([hf, hb], -1) @ params["w_compress_hn_bi"].T, 0.0)
    return out, hid, bi_hidden


if __name__ == "__main__":
    B, T, H = 4, 8, 32
    key = jax.random.PRNGKey(0)
    k_param, k_x = jax.random.split(key)
    params = init_params(k_param, H)
    prepped = prepare_params(params)

    input_var = jax.random.normal(k_x, (B, T, H), jnp.float32)
    input_lengths = jnp.array([8, 6, 4, 2], dtype=jnp.int32)

    # time_chunk=4 exercises the 2-step pipelined time grid (T=8 -> 2 chunks)
    output, hidden, bi_hidden = sentence_encoder_rnn_forward(
        prepped, input_var, input_lengths, time_chunk=4)
    jax.block_until_ready((output, hidden, bi_hidden))

    assert output.shape == (B, T, H)
    assert hidden.shape == (B, H)
    assert bi_hidden.shape == (B, T, 2 * H)

    # numerical self-check against a pure-JAX reference
    ro, rh, rb = _reference_forward(params, input_var, input_lengths)
    assert jnp.allclose(output, ro, atol=1e-4, rtol=1e-4)
    assert jnp.allclose(hidden, rh, atol=1e-4, rtol=1e-4)
    assert jnp.allclose(bi_hidden, rb, atol=1e-4, rtol=1e-4)

    print("KERNEL_OK")
</pallas_src>

<mosaic_0001>
module attributes {stable_mosaic.version = 11 : i64} {
  func.func @_input_gates_kernel(%arg0: i32, %arg1: memref<64x32xf32, #tpu.memory_space<vmem>>, %arg2: memref<32x96xf32, #tpu.memory_space<vmem>>, %arg3: memref<32x96xf32, #tpu.memory_space<vmem>>, %arg4: memref<1x96xf32, #tpu.memory_space<vmem>>, %arg5: memref<1x96xf32, #tpu.memory_space<vmem>>, %arg6: memref<64x96xf32, #tpu.memory_space<vmem>>, %arg7: memref<64x96xf32, #tpu.memory_space<vmem>>) attributes {dimension_semantics = [#tpu.dimension_semantics<parallel>], iteration_bounds = array<i64: 1>, scalar_prefetch = 0 : i64, scratch_operands = 0 : i64, tpu.core_type = #tpu.core_type<tc>, window_params = [{transform_indices = @transform_0, window_bounds = array<i64: 64, 32>}, {pipeline_mode = #tpu.pipeline_mode<synchronous>, transform_indices = @transform_1, window_bounds = array<i64: 32, 96>}, {pipeline_mode = #tpu.pipeline_mode<synchronous>, transform_indices = @transform_2, window_bounds = array<i64: 32, 96>}, {pipeline_mode = #tpu.pipeline_mode<synchronous>, transform_indices = @transform_3, window_bounds = array<i64: 1, 96>}, {pipeline_mode = #tpu.pipeline_mode<synchronous>, transform_indices = @transform_4, window_bounds = array<i64: 1, 96>}, {transform_indices = @transform_5, window_bounds = array<i64: 64, 96>}, {transform_indices = @transform_6, window_bounds = array<i64: 64, 96>}]} {
    %c0 = arith.constant 0 : index
    %c0_0 = arith.constant 0 : index
    %0 = vector.load %arg1[%c0, %c0_0] : memref<64x32xf32, #tpu.memory_space<vmem>>, vector<64x32xf32>
    %c0_1 = arith.constant 0 : index
    %c0_2 = arith.constant 0 : index
    %1 = vector.load %arg2[%c0_1, %c0_2] : memref<32x96xf32, #tpu.memory_space<vmem>>, vector<32x96xf32>
    %cst = arith.constant dense<0.000000e+00> : vector<64x96xf32>
    %2 = tpu.matmul %0, %1, %cst {dimension_numbers = #tpu.dot_dimension_numbers<[1], [0], [0], [1], [0, 0, 1, 1], [], []>} : vector<64x32xf32>, vector<32x96xf32>, vector<64x96xf32> -> vector<64x96xf32>
    %c0_3 = arith.constant 0 : index
    %c0_4 = arith.constant 0 : index
    %3 = vector.load %arg4[%c0_3, %c0_4] : memref<1x96xf32, #tpu.memory_space<vmem>>, vector<1x96xf32>
    %4 = vector.broadcast %3 : vector<1x96xf32> to vector<64x96xf32>
    %5 = arith.addf %2, %4 : vector<64x96xf32>
    %c0_5 = arith.constant 0 : index
    %c0_6 = arith.constant 0 : index
    %6 = vector.load %arg6[%c0_5, %c0_6] : memref<64x96xf32, #tpu.memory_space<vmem>>, vector<64x96xf32>
    tpu.vector_store %arg6[%c0_5, %c0_6], %5 {strides = array<i32>} : memref<64x96xf32, #tpu.memory_space<vmem>>, vector<64x96xf32>,
    %c0_7 = arith.constant 0 : index
    %c0_8 = arith.constant 0 : index
    %7 = vector.load %arg3[%c0_7, %c0_8] : memref<32x96xf32, #tpu.memory_space<vmem>>, vector<32x96xf32>
    %cst_9 = arith.constant dense<0.000000e+00> : vector<64x96xf32>
    %8 = tpu.matmul %0, %7, %cst_9 {dimension_numbers = #tpu.dot_dimension_numbers<[1], [0], [0], [1], [0, 0, 1, 1], [], []>} : vector<64x32xf32>, vector<32x96xf32>, vector<64x96xf32> -> vector<64x96xf32>
    %c0_10 = arith.constant 0 : index
    %c0_11 = arith.constant 0 : index
    %9 = vector.load %arg5[%c0_10, %c0_11] : memref<1x96xf32, #tpu.memory_space<vmem>>, vector<1x96xf32>
    %10 = vector.broadcast %9 : vector<1x96xf32> to vector<64x96xf32>
    %11 = arith.addf %8, %10 : vector<64x96xf32>
    %c0_12 = arith.constant 0 : index
    %c0_13 = arith.constant 0 : index
    %12 = vector.load %arg7[%c0_12, %c0_13] : memref<64x96xf32, #tpu.memory_space<vmem>>, vector<64x96xf32>
    tpu.vector_store %arg7[%c0_12, %c0_13], %11 {strides = array<i32>} : memref<64x96xf32, #tpu.memory_space<vmem>>, vector<64x96xf32>,
    return
  }
  func.func @transform_0(%arg0: i32) -> (i32, i32) {
    %c0_i32 = arith.constant 0 : i32
    %c0_i32_0 = arith.constant 0 : i32
    return %arg0, %c0_i32 : i32, i32
  }
  func.func @transform_1(%arg0: i32) -> (i32, i32) {
    %c0_i32 = arith.constant 0 : i32
    %c0_i32_0 = arith.constant 0 : i32
    %c0_i32_1 = arith.constant 0 : i32
    return %c0_i32, %c0_i32_0 : i32, i32
  }
  func.func @transform_2(%arg0: i32) -> (i32, i32) {
    %c0_i32 = arith.constant 0 : i32
    %c0_i32_0 = arith.constant 0 : i32
    %c0_i32_1 = arith.constant 0 : i32
    return %c0_i32, %c0_i32_0 : i32, i32
  }
  func.func @transform_3(%arg0: i32) -> (i32, i32) {
    %c0_i32 = arith.constant 0 : i32
    %c0_i32_0 = arith.constant 0 : i32
    %c0_i32_1 = arith.constant 0 : i32
    return %c0_i32, %c0_i32_0 : i32, i32
  }
  func.func @transform_4(%arg0: i32) -> (i32, i32) {
    %c0_i32 = arith.constant 0 : i32
    %c0_i32_0 = arith.constant 0 : i32
    %c0_i32_1 = arith.constant 0 : i32
    return %c0_i32, %c0_i32_0 : i32, i32
  }
  func.func @transform_5(%arg0: i32) -> (i32, i32) {
    %c0_i32 = arith.constant 0 : i32
    %c0_i32_0 = arith.constant 0 : i32
    return %arg0, %c0_i32 : i32, i32
  }
  func.func @transform_6(%arg0: i32) -> (i32, i32) {
    %c0_i32 = arith.constant 0 : i32
    %c0_i32_0 = arith.constant 0 : i32
    return %arg0, %c0_i32 : i32, i32
  }
}

module attributes {stable_mosaic.version = 11 : i64} {
  func.func @_bigru_kernel(%arg0: i32, %arg1: memref<4x8x96xf32, #tpu.memory_space<vmem>>, %arg2: memref<4x8x96xf32, #tpu.memory_space<vmem>>, %arg3: memref<8x1xi32, #tpu.memory_space<vmem>>, %arg4: memref<32x96xf32, #tpu.memory_space<vmem>>, %arg5: memref<32x96xf32, #tpu.memory_space<vmem>>, %arg6: memref<1x96xf32, #tpu.memory_space<vmem>>, %arg7: memref<1x96xf32, #tpu.memory_space<vmem>>, %arg8: memref<4x8x32xf32, #tpu.memory_space<vmem>>, %arg9: memref<4x8x32xf32, #tpu.memory_space<vmem>>, %arg10: memref<8x32xf32, #tpu.memory_space<vmem>>, %arg11: memref<8x32xf32, #tpu.memory_space<vmem>>, %arg12: memref<8x32xf32, #tpu.memory_space<vmem>>, %arg13: memref<8x32xf32, #tpu.memory_space<vmem>>) attributes {dimension_semantics = [#tpu.dimension_semantics<arbitrary>], iteration_bounds = array<i64: 2>, scalar_prefetch = 0 : i64, scratch_operands = 2 : i64, tpu.core_type = #tpu.core_type<tc>, window_params = [{transform_indices = @transform_0, window_bounds = array<i64: 4, 8, 96>}, {transform_indices = @transform_1, window_bounds = array<i64: 4, 8, 96>}, {pipeline_mode = #tpu.pipeline_mode<synchronous>, transform_indices = @transform_2, window_bounds = array<i64: 8, 1>}, {pipeline_mode = #tpu.pipeline_mode<synchronous>, transform_indices = @transform_3, window_bounds = array<i64: 32, 96>}, {pipeline_mode = #tpu.pipeline_mode<synchronous>, transform_indices = @transform_4, window_bounds = array<i64: 32, 96>}, {pipeline_mode = #tpu.pipeline_mode<synchronous>, transform_indices = @transform_5, window_bounds = array<i64: 1, 96>}, {pipeline_mode = #tpu.pipeline_mode<synchronous>, transform_indices = @transform_6, window_bounds = array<i64: 1, 96>}, {transform_indices = @transform_7, window_bounds = array<i64: 4, 8, 32>}, {transform_indices = @transform_8, window_bounds = array<i64: 4, 8, 32>}, {pipeline_mode = #tpu.pipeline_mode<synchronous>, transform_indices = @transform_9, window_bounds = array<i64: 8, 32>}, {pipeline_mode = #tpu.pipeline_mode<synchronous>, transform_indices = @transform_10, window_bounds = array<i64: 8, 32>}]} {
    %c0_i32 = arith.constant 0 : i32
    %0 = arith.cmpi eq, %arg0, %c0_i32 : i32
    %1 = arith.extui %0 : i1 to i32
    %c0_i32_0 = arith.constant 0 : i32
    %2 = arith.cmpi ne, %1, %c0_i32_0 : i32
    scf.if %2 {
      %cst_161 = arith.constant 0.000000e+00 : f32
      %424 = vector.broadcast %cst_161 : f32 to vector<8x32xf32>
      %c0_162 = arith.constant 0 : index
      %c0_163 = arith.constant 0 : index
      %425 = vector.load %arg12[%c0_162, %c0_163] : memref<8x32xf32, #tpu.memory_space<vmem>>, vector<8x32xf32>
      tpu.vector_store %arg12[%c0_162, %c0_163], %424 {strides = array<i32>} : memref<8x32xf32, #tpu.memory_space<vmem>>, vector<8x32xf32>,
      %cst_164 = arith.constant 0.000000e+00 : f32
      %426 = vector.broadcast %cst_164 : f32 to vector<8x32xf32>
      %c0_165 = arith.constant 0 : index
      %c0_166 = arith.constant 0 : index
      %427 = vector.load %arg13[%c0_165, %c0_166] : memref<8x32xf32, #tpu.memory_space<vmem>>, vector<8x32xf32>
      tpu.vector_store %arg13[%c0_165, %c0_166], %426 {strides = array<i32>} : memref<8x32xf32, #tpu.memory_space<vmem>>, vector<8x32xf32>,
    } else {
    }
    %c0 = arith.constant 0 : index
    %c0_1 = arith.constant 0 : index
    %3 = vector.load %arg3[%c0, %c0_1] : memref<8x1xi32, #tpu.memory_space<vmem>>, vector<8x1xi32>
    %c0_i32_2 = arith.constant 0 : i32
    %c4_i32 = arith.constant 4 : i32
    %4 = arith.muli %arg0, %c4_i32 : i32
    %5 = arith.addi %4, %c0_i32_2 : i32
    %c0_3 = arith.constant 0 : index
    %c0_4 = arith.constant 0 : index
    %6 = vector.load %arg12[%c0_3, %c0_4] : memref<8x32xf32, #tpu.memory_space<vmem>>, vector<8x32xf32>
    %c0_5 = arith.constant 0 : index
    %c0_6 = arith.constant 0 : index
    %7 = vector.load %arg4[%c0_5, %c0_6] : memref<32x96xf32, #tpu.memory_space<vmem>>, vector<32x96xf32>
    %cst = arith.constant dense<0.000000e+00> : vector<8x96xf32>
    %8 = tpu.matmul %6, %7, %cst {dimension_numbers = #tpu.dot_dimension_numbers<[1], [0], [0], [1], [0, 0, 1, 1], [], []>} : vector<8x32xf32>, vector<32x96xf32>, vector<8x96xf32> -> vector<8x96xf32>
    %c0_7 = arith.constant 0 : index
    %c0_8 = arith.constant 0 : index
    %9 = vector.load %arg6[%c0_7, %c0_8] : memref<1x96xf32, #tpu.memory_space<vmem>>, vector<1x96xf32>
    %10 = vector.broadcast %9 : vector<1x96xf32> to vector<8x96xf32>
    %11 = arith.addf %8, %10 : vector<8x96xf32>
    %12 = arith.index_cast %c0_i32_2 : i32 to index
    %c0_9 = arith.constant 0 : index
    %c0_10 = arith.constant 0 : index
    %13 = vector.load %arg1[%12, %c0_9, %c0_10] : memref<4x8x96xf32, #tpu.memory_space<vmem>>, vector<1x8x96xf32>
    %14 = vector.shape_cast %13 : vector<1x8x96xf32> to vector<8x96xf32>
    %15 = vector.extract_strided_slice %14 {offsets = [0, 0], sizes = [8, 32], strides = [1, 1]} : vector<8x96xf32> to vector<8x32xf32>
    %16 = vector.extract_strided_slice %11 {offsets = [0, 0], sizes = [8, 32], strides = [1, 1]} : vector<8x96xf32> to vector<8x32xf32>
    %17 = arith.addf %15, %16 : vector<8x32xf32>
    %18 = arith.negf %17 : vector<8x32xf32>
    %19 = math.exp %18 : vector<8x32xf32>
    %cst_11 = arith.constant 1.000000e+00 : f32
    %20 = vector.broadcast %cst_11 : f32 to vector<8x32xf32>
    %21 = arith.addf %20, %19 : vector<8x32xf32>
    %22 = arith.divf %20, %21 : vector<8x32xf32>
    %23 = vector.extract_strided_slice %14 {offsets = [0, 32], sizes = [8, 32], strides = [1, 1]} : vector<8x96xf32> to vector<8x32xf32>
    %24 = vector.extract_strided_slice %11 {offsets = [0, 32], sizes = [8, 32], strides = [1, 1]} : vector<8x96xf32> to vector<8x32xf32>
    %25 = arith.addf %23, %24 : vector<8x32xf32>
    %26 = arith.negf %25 : vector<8x32xf32>
    %27 = math.exp %26 : vector<8x32xf32>
    %cst_12 = arith.constant 1.000000e+00 : f32
    %28 = vector.broadcast %cst_12 : f32 to vector<8x32xf32>
    %29 = arith.addf %28, %27 : vector<8x32xf32>
    %30 = arith.divf %28, %29 : vector<8x32xf32>
    %31 = vector.extract_strided_slice %14 {offsets = [0, 64], sizes = [8, 32], strides = [1, 1]} : vector<8x96xf32> to vector<8x32xf32>
    %32 = vector.extract_strided_slice %11 {offsets = [0, 64], sizes = [8, 32], strides = [1, 1]} : vector<8x96xf32> to vector<8x32xf32>
    %33 = arith.mulf %22, %32 : vector<8x32xf32>
    %34 = arith.addf %31, %33 : vector<8x32xf32>
    %35 = math.tanh %34 : vector<8x32xf32>
    %cst_13 = arith.constant 1.000000e+00 : f32
    %36 = vector.broadcast %cst_13 : f32 to vector<8x32xf32>
    %37 = arith.subf %36, %30 : vector<8x32xf32>
    %38 = arith.mulf %37, %35 : vector<8x32xf32>
    %39 = arith.mulf %30, %6 : vector<8x32xf32>
    %40 = arith.addf %38, %39 : vector<8x32xf32>
    %41 = vector.broadcast %5 : i32 to vector<8x1xi32>
    %42 = arith.cmpi slt, %41, %3 : vector<8x1xi32>
    %43 = vector.shape_cast %42 : vector<8x1xi1> to vector<8x1xi1>
    %44 = vector.broadcast %43 : vector<8x1xi1> to vector<8x32xi1>
    %45 = arith.select %44, %40, %6 : vector<8x32xi1>, vector<8x32xf32>
    %c0_14 = arith.constant 0 : index
    %c0_15 = arith.constant 0 : index
    %46 = vector.load %arg12[%c0_14, %c0_15] : memref<8x32xf32, #tpu.memory_space<vmem>>, vector<8x32xf32>
    tpu.vector_store %arg12[%c0_14, %c0_15], %45 {strides = array<i32>} : memref<8x32xf32, #tpu.memory_space<vmem>>, vector<8x32xf32>,
    %cst_16 = arith.constant 0.000000e+00 : f32
    %47 = vector.shape_cast %42 : vector<8x1xi1> to vector<8x1xi1>
    %48 = vector.broadcast %47 : vector<8x1xi1> to vector<8x32xi1>
    %49 = vector.broadcast %cst_16 : f32 to vector<8x32xf32>
    %50 = arith.select %48, %45, %49 : vector<8x32xi1>, vector<8x32xf32>
    %51 = arith.index_cast %c0_i32_2 : i32 to index
    %c0_17 = arith.constant 0 : index
    %c0_18 = arith.constant 0 : index
    %52 = vector.load %arg8[%51, %c0_17, %c0_18] : memref<4x8x32xf32, #tpu.memory_space<vmem>>, vector<1x8x32xf32>
    %53 = vector.shape_cast %52 : vector<1x8x32xf32> to vector<8x32xf32>
    %54 = vector.shape_cast %50 : vector<8x32xf32> to vector<1x8x32xf32>
    tpu.vector_store %arg8[%51, %c0_17, %c0_18], %54 {strides = array<i32>} : memref<4x8x32xf32, #tpu.memory_space<vmem>>, vector<1x8x32xf32>,
    %c3_i32 = arith.constant 3 : i32
    %55 = arith.subi %c3_i32, %c0_i32_2 : i32
    %c4_i32_19 = arith.constant 4 : i32
    %56 = arith.muli %arg0, %c4_i32_19 : i32
    %57 = arith.addi %56, %c0_i32_2 : i32
    %c7_i32 = arith.constant 7 : i32
    %58 = arith.subi %c7_i32, %57 : i32
    %c0_20 = arith.constant 0 : index
    %c0_21 = arith.constant 0 : index
    %59 = vector.load %arg13[%c0_20, %c0_21] : memref<8x32xf32, #tpu.memory_space<vmem>>, vector<8x32xf32>
    %c0_22 = arith.constant 0 : index
    %c0_23 = arith.constant 0 : index
    %60 = vector.load %arg5[%c0_22, %c0_23] : memref<32x96xf32, #tpu.memory_space<vmem>>, vector<32x96xf32>
    %cst_24 = arith.constant dense<0.000000e+00> : vector<8x96xf32>
    %61 = tpu.matmul %59, %60, %cst_24 {dimension_numbers = #tpu.dot_dimension_numbers<[1], [0], [0], [1], [0, 0, 1, 1], [], []>} : vector<8x32xf32>, vector<32x96xf32>, vector<8x96xf32> -> vector<8x96xf32>
    %c0_25 = arith.constant 0 : index
    %c0_26 = arith.constant 0 : index
    %62 = vector.load %arg7[%c0_25, %c0_26] : memref<1x96xf32, #tpu.memory_space<vmem>>, vector<1x96xf32>
    %63 = vector.broadcast %62 : vector<1x96xf32> to vector<8x96xf32>
    %64 = arith.addf %61, %63 : vector<8x96xf32>
    %65 = arith.index_cast %55 : i32 to index
    %c0_27 = arith.constant 0 : index
    %c0_28 = arith.constant 0 : index
    %66 = vector.load %arg2[%65, %c0_27, %c0_28] : memref<4x8x96xf32, #tpu.memory_space<vmem>>, vector<1x8x96xf32>
    %67 = vector.shape_cast %66 : vector<1x8x96xf32> to vector<8x96xf32>
    %68 = vector.extract_strided_slice %67 {offsets = [0, 0], sizes = [8, 32], strides = [1, 1]} : vector<8x96xf32> to vector<8x32xf32>
    %69 = vector.extract_strided_slice %64 {offsets = [0, 0], sizes = [8, 32], strides = [1, 1]} : vector<8x96xf32> to vector<8x32xf32>
    %70 = arith.addf %68, %69 : vector<8x32xf32>
    %71 = arith.negf %70 : vector<8x32xf32>
    %72 = math.exp %71 : vector<8x32xf32>
    %cst_29 = arith.constant 1.000000e+00 : f32
    %73 = vector.broadcast %cst_29 : f32 to vector<8x32xf32>
    %74 = arith.addf %73, %72 : vector<8x32xf32>
    %75 = arith.divf %73, %74 : vector<8x32xf32>
    %76 = vector.extract_strided_slice %67 {offsets = [0, 32], sizes = [8, 32], strides = [1, 1]} : vector<8x96xf32> to vector<8x32xf32>
    %77 = vector.extract_strided_slice %64 {offsets = [0, 32], sizes = [8, 32], strides = [1, 1]} : vector<8x96xf32> to vector<8x32xf32>
    %78 = arith.addf %76, %77 : vector<8x32xf32>
    %79 = arith.negf %78 : vector<8x32xf32>
    %80 = math.exp %79 : vector<8x32xf32>
    %cst_30 = arith.constant 1.000000e+00 : f32
    %81 = vector.broadcast %cst_30 : f32 to vector<8x32xf32>
    %82 = arith.addf %81, %80 : vector<8x32xf32>
    %83 = arith.divf %81, %82 : vector<8x32xf32>
    %84 = vector.extract_strided_slice %67 {offsets = [0, 64], sizes = [8, 32], strides = [1, 1]} : vector<8x96xf32> to vector<8x32xf32>
    %85 = vector.extract_strided_slice %64 {offsets = [0, 64], sizes = [8, 32], strides = [1, 1]} : vector<8x96xf32> to vector<8x32xf32>
    %86 = arith.mulf %75, %85 : vector<8x32xf32>
    %87 = arith.addf %84, %86 : vector<8x32xf32>
    %88 = math.tanh %87 : vector<8x32xf32>
    %cst_31 = arith.constant 1.000000e+00 : f32
    %89 = vector.broadcast %cst_31 : f32 to vector<8x32xf32>
    %90 = arith.subf %89, %83 : vector<8x32xf32>
    %91 = arith.mulf %90, %88 : vector<8x32xf32>
    %92 = arith.mulf %83, %59 : vector<8x32xf32>
    %93 = arith.addf %91, %92 : vector<8x32xf32>
    %94 = vector.broadcast %58 : i32 to vector<8x1xi32>
    %95 = arith.cmpi slt, %94, %3 : vector<8x1xi32>
    %96 = vector.shape_cast %95 : vector<8x1xi1> to vector<8x1xi1>
    %97 = vector.broadcast %96 : vector<8x1xi1> to vector<8x32xi1>
    %98 = arith.select %97, %93, %59 : vector<8x32xi1>, vector<8x32xf32>
    %c0_32 = arith.constant 0 : index
    %c0_33 = arith.constant 0 : index
    %99 = vector.load %arg13[%c0_32, %c0_33] : memref<8x32xf32, #tpu.memory_space<vmem>>, vector<8x32xf32>
    tpu.vector_store %arg13[%c0_32, %c0_33], %98 {strides = array<i32>} : memref<8x32xf32, #tpu.memory_space<vmem>>, vector<8x32xf32>,
    %cst_34 = arith.constant 0.000000e+00 : f32
    %100 = vector.shape_cast %95 : vector<8x1xi1> to vector<8x1xi1>
    %101 = vector.broadcast %100 : vector<8x1xi1> to vector<8x32xi1>
    %102 = vector.broadcast %cst_34 : f32 to vector<8x32xf32>
    %103 = arith.select %101, %98, %102 : vector<8x32xi1>, vector<8x32xf32>
    %104 = arith.index_cast %55 : i32 to index
    %c0_35 = arith.constant 0 : index
    %c0_36 = arith.constant 0 : index
    %105 = vector.load %arg9[%104, %c0_35, %c0_36] : memref<4x8x32xf32, #tpu.memory_space<vmem>>, vector<1x8x32xf32>
    %106 = vector.shape_cast %105 : vector<1x8x32xf32> to vector<8x32xf32>
    %107 = vector.shape_cast %103 : vector<8x32xf32> to vector<1x8x32xf32>
    tpu.vector_store %arg9[%104, %c0_35, %c0_36], %107 {strides = array<i32>} : memref<4x8x32xf32, #tpu.memory_space<vmem>>, vector<1x8x32xf32>,
    %c1_i32 = arith.constant 1 : i32
    %c4_i32_37 = arith.constant 4 : i32
    %108 = arith.muli %arg0, %c4_i32_37 : i32
    %109 = arith.addi %108, %c1_i32 : i32
    %c0_38 = arith.constant 0 : index
    %c0_39 = arith.constant 0 : index
    %110 = vector.load %arg12[%c0_38, %c0_39] : memref<8x32xf32, #tpu.memory_space<vmem>>, vector<8x32xf32>
    %c0_40 = arith.constant 0 : index
    %c0_41 = arith.constant 0 : index
    %111 = vector.load %arg4[%c0_40, %c0_41] : memref<32x96xf32, #tpu.memory_space<vmem>>, vector<32x96xf32>
    %cst_42 = arith.constant dense<0.000000e+00> : vector<8x96xf32>
    %112 = tpu.matmul %110, %111, %cst_42 {dimension_numbers = #tpu.dot_dimension_numbers<[1], [0], [0], [1], [0, 0, 1, 1], [], []>} : vector<8x32xf32>, vector<32x96xf32>, vector<8x96xf32> -> vector<8x96xf32>
    %c0_43 = arith.constant 0 : index
    %c0_44 = arith.constant 0 : index
    %113 = vector.load %arg6[%c0_43, %c0_44] : memref<1x96xf32, #tpu.memory_space<vmem>>, vector<1x96xf32>
    %114 = vector.broadcast %113 : vector<1x96xf32> to vector<8x96xf32>
    %115 = arith.addf %112, %114 : vector<8x96xf32>
    %116 = arith.index_cast %c1_i32 : i32 to index
    %c0_45 = arith.constant 0 : index
    %c0_46 = arith.constant 0 : index
    %117 = vector.load %arg1[%116, %c0_45, %c0_46] : memref<4x8x96xf32, #tpu.memory_space<vmem>>, vector<1x8x96xf32>
    %118 = vector.shape_cast %117 : vector<1x8x96xf32> to vector<8x96xf32>
    %119 = vector.extract_strided_slice %118 {offsets = [0, 0], sizes = [8, 32], strides = [1, 1]} : vector<8x96xf32> to vector<8x32xf32>
    %120 = vector.extract_strided_slice %115 {offsets = [0, 0], sizes = [8, 32], strides = [1, 1]} : vector<8x96xf32> to vector<8x32xf32>
    %121 = arith.addf %119, %120 : vector<8x32xf32>
    %122 = arith.negf %121 : vector<8x32xf32>
    %123 = math.exp %122 : vector<8x32xf32>
    %cst_47 = arith.constant 1.000000e+00 : f32
    %124 = vector.broadcast %cst_47 : f32 to vector<8x32xf32>
    %125 = arith.addf %124, %123 : vector<8x32xf32>
    %126 = arith.divf %124, %125 : vector<8x32xf32>
    %127 = vector.extract_strided_slice %118 {offsets = [0, 32], sizes = [8, 32], strides = [1, 1]} : vector<8x96xf32> to vector<8x32xf32>
    %128 = vector.extract_strided_slice %115 {offsets = [0, 32], sizes = [8, 32], strides = [1, 1]} : vector<8x96xf32> to vector<8x32xf32>
    %129 = arith.addf %127, %128 : vector<8x32xf32>
    %130 = arith.negf %129 : vector<8x32xf32>
    %131 = math.exp %130 : vector<8x32xf32>
    %cst_48 = arith.constant 1.000000e+00 : f32
    %132 = vector.broadcast %cst_48 : f32 to vector<8x32xf32>
    %133 = arith.addf %132, %131 : vector<8x32xf32>
    %134 = arith.divf %132, %133 : vector<8x32xf32>
    %135 = vector.extract_strided_slice %118 {offsets = [0, 64], sizes = [8, 32], strides = [1, 1]} : vector<8x96xf32> to vector<8x32xf32>
    %136 = vector.extract_strided_slice %115 {offsets = [0, 64], sizes = [8, 32], strides = [1, 1]} : vector<8x96xf32> to vector<8x32xf32>
    %137 = arith.mulf %126, %136 : vector<8x32xf32>
    %138 = arith.addf %135, %137 : vector<8x32xf32>
    %139 = math.tanh %138 : vector<8x32xf32>
    %cst_49 = arith.constant 1.000000e+00 : f32
    %140 = vector.broadcast %cst_49 : f32 to vector<8x32xf32>
    %141 = arith.subf %140, %134 : vector<8x32xf32>
    %142 = arith.mulf %141, %139 : vector<8x32xf32>
    %143 = arith.mulf %134, %110 : vector<8x32xf32>
    %144 = arith.addf %142, %143 : vector<8x32xf32>
    %145 = vector.broadcast %109 : i32 to vector<8x1xi32>
    %146 = arith.cmpi slt, %145, %3 : vector<8x1xi32>
    %147 = vector.shape_cast %146 : vector<8x1xi1> to vector<8x1xi1>
    %148 = vector.broadcast %147 : vector<8x1xi1> to vector<8x32xi1>
    %149 = arith.select %148, %144, %110 : vector<8x32xi1>, vector<8x32xf32>
    %c0_50 = arith.constant 0 : index
    %c0_51 = arith.constant 0 : index
    %150 = vector.load %arg12[%c0_50, %c0_51] : memref<8x32xf32, #tpu.memory_space<vmem>>, vector<8x32xf32>
    tpu.vector_store %arg12[%c0_50, %c0_51], %149 {strides = array<i32>} : memref<8x32xf32, #tpu.memory_space<vmem>>, vector<8x32xf32>,
    %cst_52 = arith.constant 0.000000e+00 : f32
    %151 = vector.shape_cast %146 : vector<8x1xi1> to vector<8x1xi1>
    %152 = vector.broadcast %151 : vector<8x1xi1> to vector<8x32xi1>
    %153 = vector.broadcast %cst_52 : f32 to vector<8x32xf32>
    %154 = arith.select %152, %149, %153 : vector<8x32xi1>, vector<8x32xf32>
    %155 = arith.index_cast %c1_i32 : i32 to index
    %c0_53 = arith.constant 0 : index
    %c0_54 = arith.constant 0 : index
    %156 = vector.load %arg8[%155, %c0_53, %c0_54] : memref<4x8x32xf32, #tpu.memory_space<vmem>>, vector<1x8x32xf32>
    %157 = vector.shape_cast %156 : vector<1x8x32xf32> to vector<8x32xf32>
    %158 = vector.shape_cast %154 : vector<8x32xf32> to vector<1x8x32xf32>
    tpu.vector_store %arg8[%155, %c0_53, %c0_54], %158 {strides = array<i32>} : memref<4x8x32xf32, #tpu.memory_space<vmem>>, vector<1x8x32xf32>,
    %c3_i32_55 = arith.constant 3 : i32
    %159 = arith.subi %c3_i32_55, %c1_i32 : i32
    %c4_i32_56 = arith.constant 4 : i32
    %160 = arith.muli %arg0, %c4_i32_56 : i32
    %161 = arith.addi %160, %c1_i32 : i32
    %c7_i32_57 = arith.constant 7 : i32
    %162 = arith.subi %c7_i32_57, %161 : i32
    %c0_58 = arith.constant 0 : index
    %c0_59 = arith.constant 0 : index
    %163 = vector.load %arg13[%c0_58, %c0_59] : memref<8x32xf32, #tpu.memory_space<vmem>>, vector<8x32xf32>
    %c0_60 = arith.constant 0 : index
    %c0_61 = arith.constant 0 : index
    %164 = vector.load %arg5[%c0_60, %c0_61] : memref<32x96xf32, #tpu.memory_space<vmem>>, vector<32x96xf32>
    %cst_62 = arith.constant dense<0.000000e+00> : vector<8x96xf32>
    %165 = tpu.matmul %163, %164, %cst_62 {dimension_numbers = #tpu.dot_dimension_numbers<[1], [0], [0], [1], [0, 0, 1, 1], [], []>} : vector<8x32xf32>, vector<32x96xf32>, vector<8x96xf32> -> vector<8x96xf32>
    %c0_63 = arith.constant 0 : index
    %c0_64 = arith.constant 0 : index
    %166 = vector.load %arg7[%c0_63, %c0_64] : memref<1x96xf32, #tpu.memory_space<vmem>>, vector<1x96xf32>
    %167 = vector.broadcast %166 : vector<1x96xf32> to vector<8x96xf32>
    %168 = arith.addf %165, %167 : vector<8x96xf32>
    %169 = arith.index_cast %159 : i32 to index
    %c0_65 = arith.constant 0 : index
    %c0_66 = arith.constant 0 : index
    %170 = vector.load %arg2[%169, %c0_65, %c0_66] : memref<4x8x96xf32, #tpu.memory_space<vmem>>, vector<1x8x96xf32>
    %171 = vector.shape_cast %170 : vector<1x8x96xf32> to vector<8x96xf32>
    %172 = vector.extract_strided_slice %171 {offsets = [0, 0], sizes = [8, 32], strides = [1, 1]} : vector<8x96xf32> to vector<8x32xf32>
    %173 = vector.extract_strided_slice %168 {offsets = [0, 0], sizes = [8, 32], strides = [1, 1]} : vector<8x96xf32> to vector<8x32xf32>
    %174 = arith.addf %172, %173 : vector<8x32xf32>
    %175 = arith.negf %174 : vector<8x32xf32>
    %176 = math.exp %175 : vector<8x32xf32>
    %cst_67 = arith.constant 1.000000e+00 : f32
    %177 = vector.broadcast %cst_67 : f32 to vector<8x32xf32>
    %178 = arith.addf %177, %176 : vector<8x32xf32>
    %179 = arith.divf %177, %178 : vector<8x32xf32>
    %180 = vector.extract_strided_slice %171 {offsets = [0, 32], sizes = [8, 32], strides = [1, 1]} : vector<8x96xf32> to vector<8x32xf32>
    %181 = vector.extract_strided_slice %168 {offsets = [0, 32], sizes = [8, 32], strides = [1, 1]} : vector<8x96xf32> to vector<8x32xf32>
    %182 = arith.addf %180, %181 : vector<8x32xf32>
    %183 = arith.negf %182 : vector<8x32xf32>
    %184 = math.exp %183 : vector<8x32xf32>
    %cst_68 = arith.constant 1.000000e+00 : f32
    %185 = vector.broadcast %cst_68 : f32 to vector<8x32xf32>
    %186 = arith.addf %185, %184 : vector<8x32xf32>
    %187 = arith.divf %185, %186 : vector<8x32xf32>
    %188 = vector.extract_strided_slice %171 {offsets = [0, 64], sizes = [8, 32], strides = [1, 1]} : vector<8x96xf32> to vector<8x32xf32>
    %189 = vector.extract_strided_slice %168 {offsets = [0, 64], sizes = [8, 32], strides = [1, 1]} : vector<8x96xf32> to vector<8x32xf32>
    %190 = arith.mulf %179, %189 : vector<8x32xf32>
    %191 = arith.addf %188, %190 : vector<8x32xf32>
    %192 = math.tanh %191 : vector<8x32xf32>
    %cst_69 = arith.constant 1.000000e+00 : f32
    %193 = vector.broadcast %cst_69 : f32 to vector<8x32xf32>
    %194 = arith.subf %193, %187 : vector<8x32xf32>
    %195 = arith.mulf %194, %192 : vector<8x32xf32>
    %196 = arith.mulf %187, %163 : vector<8x32xf32>
    %197 = arith.addf %195, %196 : vector<8x32xf32>
    %198 = vector.broadcast %162 : i32 to vector<8x1xi32>
    %199 = arith.cmpi slt, %198, %3 : vector<8x1xi32>
    %200 = vector.shape_cast %199 : vector<8x1xi1> to vector<8x1xi1>
    %201 = vector.broadcast %200 : vector<8x1xi1> to vector<8x32xi1>
    %202 = arith.select %201, %197, %163 : vector<8x32xi1>, vector<8x32xf32>
    %c0_70 = arith.constant 0 : index
    %c0_71 = arith.constant 0 : index
    %203 = vector.load %arg13[%c0_70, %c0_71] : memref<8x32xf32, #tpu.memory_space<vmem>>, vector<8x32xf32>
    tpu.vector_store %arg13[%c0_70, %c0_71], %202 {strides = array<i32>} : memref<8x32xf32, #tpu.memory_space<vmem>>, vector<8x32xf32>,
    %cst_72 = arith.constant 0.000000e+00 : f32
    %204 = vector.shape_cast %199 : vector<8x1xi1> to vector<8x1xi1>
    %205 = vector.broadcast %204 : vector<8x1xi1> to vector<8x32xi1>
    %206 = vector.broadcast %cst_72 : f32 to vector<8x32xf32>
    %207 = arith.select %205, %202, %206 : vector<8x32xi1>, vector<8x32xf32>
    %208 = arith.index_cast %159 : i32 to index
    %c0_73 = arith.constant 0 : index
    %c0_74 = arith.constant 0 : index
    %209 = vector.load %arg9[%208, %c0_73, %c0_74] : memref<4x8x32xf32, #tpu.memory_space<vmem>>, vector<1x8x32xf32>
    %210 = vector.shape_cast %209 : vector<1x8x32xf32> to vector<8x32xf32>
    %211 = vector.shape_cast %207 : vector<8x32xf32> to vector<1x8x32xf32>
    tpu.vector_store %arg9[%208, %c0_73, %c0_74], %211 {strides = array<i32>} : memref<4x8x32xf32, #tpu.memory_space<vmem>>, vector<1x8x32xf32>,
    %c2_i32 = arith.constant 2 : i32
    %c4_i32_75 = arith.constant 4 : i32
    %212 = arith.muli %arg0, %c4_i32_75 : i32
    %213 = arith.addi %212, %c2_i32 : i32
    %c0_76 = arith.constant 0 : index
    %c0_77 = arith.constant 0 : index
    %214 = vector.load %arg12[%c0_76, %c0_77] : memref<8x32xf32, #tpu.memory_space<vmem>>, vector<8x32xf32>
    %c0_78 = arith.constant 0 : index
    %c0_79 = arith.constant 0 : index
    %215 = vector.load %arg4[%c0_78, %c0_79] : memref<32x96xf32, #tpu.memory_space<vmem>>, vector<32x96xf32>
    %cst_80 = arith.constant dense<0.000000e+00> : vector<8x96xf32>
    %216 = tpu.matmul %214, %215, %cst_80 {dimension_numbers = #tpu.dot_dimension_numbers<[1], [0], [0], [1], [0, 0, 1, 1], [], []>} : vector<8x32xf32>, vector<32x96xf32>, vector<8x96xf32> -> vector<8x96xf32>
    %c0_81 = arith.constant 0 : index
    %c0_82 = arith.constant 0 : index
    %217 = vector.load %arg6[%c0_81, %c0_82] : memref<1x96xf32, #tpu.memory_space<vmem>>, vector<1x96xf32>
    %218 = vector.broadcast %217 : vector<1x96xf32> to vector<8x96xf32>
    %219 = arith.addf %216, %218 : vector<8x96xf32>
    %220 = arith.index_cast %c2_i32 : i32 to index
    %c0_83 = arith.constant 0 : index
    %c0_84 = arith.constant 0 : index
    %221 = vector.load %arg1[%220, %c0_83, %c0_84] : memref<4x8x96xf32, #tpu.memory_space<vmem>>, vector<1x8x96xf32>
    %222 = vector.shape_cast %221 : vector<1x8x96xf32> to vector<8x96xf32>
    %223 = vector.extract_strided_slice %222 {offsets = [0, 0], sizes = [8, 32], strides = [1, 1]} : vector<8x96xf32> to vector<8x32xf32>
    %224 = vector.extract_strided_slice %219 {offsets = [0, 0], sizes = [8, 32], strides = [1, 1]} : vector<8x96xf32> to vector<8x32xf32>
    %225 = arith.addf %223, %224 : vector<8x32xf32>
    %226 = arith.negf %225 : vector<8x32xf32>
    %227 = math.exp %226 : vector<8x32xf32>
    %cst_85 = arith.constant 1.000000e+00 : f32
    %228 = vector.broadcast %cst_85 : f32 to vector<8x32xf32>
    %229 = arith.addf %228, %227 : vector<8x32xf32>
    %230 = arith.divf %228, %229 : vector<8x32xf32>
    %231 = vector.extract_strided_slice %222 {offsets = [0, 32], sizes = [8, 32], strides = [1, 1]} : vector<8x96xf32> to vector<8x32xf32>
    %232 = vector.extract_strided_slice %219 {offsets = [0, 32], sizes = [8, 32], strides = [1, 1]} : vector<8x96xf32> to vector<8x32xf32>
    %233 = arith.addf %231, %232 : vector<8x32xf32>
    %234 = arith.negf %233 : vector<8x32xf32>
    %235 = math.exp %234 : vector<8x32xf32>
    %cst_86 = arith.constant 1.000000e+00 : f32
    %236 = vector.broadcast %cst_86 : f32 to vector<8x32xf32>
    %237 = arith.addf %236, %235 : vector<8x32xf32>
    %238 = arith.divf %236, %237 : vector<8x32xf32>
    %239 = vector.extract_strided_slice %222 {offsets = [0, 64], sizes = [8, 32], strides = [1, 1]} : vector<8x96xf32> to vector<8x32xf32>
    %240 = vector.extract_strided_slice %219 {offsets = [0, 64], sizes = [8, 32], strides = [1, 1]} : vector<8x96xf32> to vector<8x32xf32>
    %241 = arith.mulf %230, %240 : vector<8x32xf32>
    %242 = arith.addf %239, %241 : vector<8x32xf32>
    %243 = math.tanh %242 : vector<8x32xf32>
    %cst_87 = arith.constant 1.000000e+00 : f32
    %244 = vector.broadcast %cst_87 : f32 to vector<8x32xf32>
    %245 = arith.subf %244, %238 : vector<8x32xf32>
    %246 = arith.mulf %245, %243 : vector<8x32xf32>
    %247 = arith.mulf %238, %214 : vector<8x32xf32>
    %248 = arith.addf %246, %247 : vector<8x32xf32>
    %249 = vector.broadcast %213 : i32 to vector<8x1xi32>
    %250 = arith.cmpi slt, %249, %3 : vector<8x1xi32>
    %251 = vector.shape_cast %250 : vector<8x1xi1> to vector<8x1xi1>
    %252 = vector.broadcast %251 : vector<8x1xi1> to vector<8x32xi1>
    %253 = arith.select %252, %248, %214 : vector<8x32xi1>, vector<8x32xf32>
    %c0_88 = arith.constant 0 : index
    %c0_89 = arith.constant 0 : index
    %254 = vector.load %arg12[%c0_88, %c0_89] : memref<8x32xf32, #tpu.memory_space<vmem>>, vector<8x32xf32>
    tpu.vector_store %arg12[%c0_88, %c0_89], %253 {strides = array<i32>} : memref<8x32xf32, #tpu.memory_space<vmem>>, vector<8x32xf32>,
    %cst_90 = arith.constant 0.000000e+00 : f32
    %255 = vector.shape_cast %250 : vector<8x1xi1> to vector<8x1xi1>
    %256 = vector.broadcast %255 : vector<8x1xi1> to vector<8x32xi1>
    %257 = vector.broadcast %cst_90 : f32 to vector<8x32xf32>
    %258 = arith.select %256, %253, %257 : vector<8x32xi1>, vector<8x32xf32>
    %259 = arith.index_cast %c2_i32 : i32 to index
    %c0_91 = arith.constant 0 : index
    %c0_92 = arith.constant 0 : index
    %260 = vector.load %arg8[%259, %c0_91, %c0_92] : memref<4x8x32xf32, #tpu.memory_space<vmem>>, vector<1x8x32xf32>
    %261 = vector.shape_cast %260 : vector<1x8x32xf32> to vector<8x32xf32>
    %262 = vector.shape_cast %258 : vector<8x32xf32> to vector<1x8x32xf32>
    tpu.vector_store %arg8[%259, %c0_91, %c0_92], %262 {strides = array<i32>} : memref<4x8x32xf32, #tpu.memory_space<vmem>>, vector<1x8x32xf32>,
    %c3_i32_93 = arith.constant 3 : i32
    %263 = arith.subi %c3_i32_93, %c2_i32 : i32
    %c4_i32_94 = arith.constant 4 : i32
    %264 = arith.muli %arg0, %c4_i32_94 : i32
    %265 = arith.addi %264, %c2_i32 : i32
    %c7_i32_95 = arith.constant 7 : i32
    %266 = arith.subi %c7_i32_95, %265 : i32
    %c0_96 = arith.constant 0 : index
    %c0_97 = arith.constant 0 : index
    %267 = vector.load %arg13[%c0_96, %c0_97] : memref<8x32xf32, #tpu.memory_space<vmem>>, vector<8x32xf32>
    %c0_98 = arith.constant 0 : index
    %c0_99 = arith.constant 0 : index
    %268 = vector.load %arg5[%c0_98, %c0_99] : memref<32x96xf32, #tpu.memory_space<vmem>>, vector<32x96xf32>
    %cst_100 = arith.constant dense<0.000000e+00> : vector<8x96xf32>
    %269 = tpu.matmul %267, %268, %cst_100 {dimension_numbers = #tpu.dot_dimension_numbers<[1], [0], [0], [1], [0, 0, 1, 1], [], []>} : vector<8x32xf32>, vector<32x96xf32>, vector<8x96xf32> -> vector<8x96xf32>
    %c0_101 = arith.constant 0 : index
    %c0_102 = arith.constant 0 : index
    %270 = vector.load %arg7[%c0_101, %c0_102] : memref<1x96xf32, #tpu.memory_space<vmem>>, vector<1x96xf32>
    %271 = vector.broadcast %270 : vector<1x96xf32> to vector<8x96xf32>
    %272 = arith.addf %269, %271 : vector<8x96xf32>
    %273 = arith.index_cast %263 : i32 to index
    %c0_103 = arith.constant 0 : index
    %c0_104 = arith.constant 0 : index
    %274 = vector.load %arg2[%273, %c0_103, %c0_104] : memref<4x8x96xf32, #tpu.memory_space<vmem>>, vector<1x8x96xf32>
    %275 = vector.shape_cast %274 : vector<1x8x96xf32> to vector<8x96xf32>
    %276 = vector.extract_strided_slice %275 {offsets = [0, 0], sizes = [8, 32], strides = [1, 1]} : vector<8x96xf32> to vector<8x32xf32>
    %277 = vector.extract_strided_slice %272 {offsets = [0, 0], sizes = [8, 32], strides = [1, 1]} : vector<8x96xf32> to vector<8x32xf32>
    %278 = arith.addf %276, %277 : vector<8x32xf32>
    %279 = arith.negf %278 : vector<8x32xf32>
    %280 = math.exp %279 : vector<8x32xf32>
    %cst_105 = arith.constant 1.000000e+00 : f32
    %281 = vector.broadcast %cst_105 : f32 to vector<8x32xf32>
    %282 = arith.addf %281, %280 : vector<8x32xf32>
    %283 = arith.divf %281, %282 : vector<8x32xf32>
    %284 = vector.extract_strided_slice %275 {offsets = [0, 32], sizes = [8, 32], strides = [1, 1]} : vector<8x96xf32> to vector<8x32xf32>
    %285 = vector.extract_strided_slice %272 {offsets = [0, 32], sizes = [8, 32], strides = [1, 1]} : vector<8x96xf32> to vector<8x32xf32>
    %286 = arith.addf %284, %285 : vector<8x32xf32>
    %287 = arith.negf %286 : vector<8x32xf32>
    %288 = math.exp %287 : vector<8x32xf32>
    %cst_106 = arith.constant 1.000000e+00 : f32
    %289 = vector.broadcast %cst_106 : f32 to vector<8x32xf32>
    %290 = arith.addf %289, %288 : vector<8x32xf32>
    %291 = arith.divf %289, %290 : vector<8x32xf32>
    %292 = vector.extract_strided_slice %275 {offsets = [0, 64], sizes = [8, 32], strides = [1, 1]} : vector<8x96xf32> to vector<8x32xf32>
    %293 = vector.extract_strided_slice %272 {offsets = [0, 64], sizes = [8, 32], strides = [1, 1]} : vector<8x96xf32> to vector<8x32xf32>
    %294 = arith.mulf %283, %293 : vector<8x32xf32>
    %295 = arith.addf %292, %294 : vector<8x32xf32>
    %296 = math.tanh %295 : vector<8x32xf32>
    %cst_107 = arith.constant 1.000000e+00 : f32
    %297 = vector.broadcast %cst_107 : f32 to vector<8x32xf32>
    %298 = arith.subf %297, %291 : vector<8x32xf32>
    %299 = arith.mulf %298, %296 : vector<8x32xf32>
    %300 = arith.mulf %291, %267 : vector<8x32xf32>
    %301 = arith.addf %299, %300 : vector<8x32xf32>
    %302 = vector.broadcast %266 : i32 to vector<8x1xi32>
    %303 = arith.cmpi slt, %302, %3 : vector<8x1xi32>
    %304 = vector.shape_cast %303 : vector<8x1xi1> to vector<8x1xi1>
    %305 = vector.broadcast %304 : vector<8x1xi1> to vector<8x32xi1>
    %306 = arith.select %305, %301, %267 : vector<8x32xi1>, vector<8x32xf32>
    %c0_108 = arith.constant 0 : index
    %c0_109 = arith.constant 0 : index
    %307 = vector.load %arg13[%c0_108, %c0_109] : memref<8x32xf32, #tpu.memory_space<vmem>>, vector<8x32xf32>
    tpu.vector_store %arg13[%c0_108, %c0_109], %306 {strides = array<i32>} : memref<8x32xf32, #tpu.memory_space<vmem>>, vector<8x32xf32>,
    %cst_110 = arith.constant 0.000000e+00 : f32
    %308 = vector.shape_cast %303 : vector<8x1xi1> to vector<8x1xi1>
    %309 = vector.broadcast %308 : vector<8x1xi1> to vector<8x32xi1>
    %310 = vector.broadcast %cst_110 : f32 to vector<8x32xf32>
    %311 = arith.select %309, %306, %310 : vector<8x32xi1>, vector<8x32xf32>
    %312 = arith.index_cast %263 : i32 to index
    %c0_111 = arith.constant 0 : index
    %c0_112 = arith.constant 0 : index
    %313 = vector.load %arg9[%312, %c0_111, %c0_112] : memref<4x8x32xf32, #tpu.memory_space<vmem>>, vector<1x8x32xf32>
    %314 = vector.shape_cast %313 : vector<1x8x32xf32> to vector<8x32xf32>
    %315 = vector.shape_cast %311 : vector<8x32xf32> to vector<1x8x32xf32>
    tpu.vector_store %arg9[%312, %c0_111, %c0_112], %315 {strides = array<i32>} : memref<4x8x32xf32, #tpu.memory_space<vmem>>, vector<1x8x32xf32>,
    %c3_i32_113 = arith.constant 3 : i32
    %c4_i32_114 = arith.constant 4 : i32
    %316 = arith.muli %arg0, %c4_i32_114 : i32
    %317 = arith.addi %316, %c3_i32_113 : i32
    %c0_115 = arith.constant 0 : index
    %c0_116 = arith.constant 0 : index
    %318 = vector.load %arg12[%c0_115, %c0_116] : memref<8x32xf32, #tpu.memory_space<vmem>>, vector<8x32xf32>
    %c0_117 = arith.constant 0 : index
    %c0_118 = arith.constant 0 : index
    %319 = vector.load %arg4[%c0_117, %c0_118] : memref<32x96xf32, #tpu.memory_space<vmem>>, vector<32x96xf32>
    %cst_119 = arith.constant dense<0.000000e+00> : vector<8x96xf32>
    %320 = tpu.matmul %318, %319, %cst_119 {dimension_numbers = #tpu.dot_dimension_numbers<[1], [0], [0], [1], [0, 0, 1, 1], [], []>} : vector<8x32xf32>, vector<32x96xf32>, vector<8x96xf32> -> vector<8x96xf32>
    %c0_120 = arith.constant 0 : index
    %c0_121 = arith.constant 0 : index
    %321 = vector.load %arg6[%c0_120, %c0_121] : memref<1x96xf32, #tpu.memory_space<vmem>>, vector<1x96xf32>
    %322 = vector.broadcast %321 : vector<1x96xf32> to vector<8x96xf32>
    %323 = arith.addf %320, %322 : vector<8x96xf32>
    %324 = arith.index_cast %c3_i32_113 : i32 to index
    %c0_122 = arith.constant 0 : index
    %c0_123 = arith.constant 0 : index
    %325 = vector.load %arg1[%324, %c0_122, %c0_123] : memref<4x8x96xf32, #tpu.memory_space<vmem>>, vector<1x8x96xf32>
    %326 = vector.shape_cast %325 : vector<1x8x96xf32> to vector<8x96xf32>
    %327 = vector.extract_strided_slice %326 {offsets = [0, 0], sizes = [8, 32], strides = [1, 1]} : vector<8x96xf32> to vector<8x32xf32>
    %328 = vector.extract_strided_slice %323 {offsets = [0, 0], sizes = [8, 32], strides = [1, 1]} : vector<8x96xf32> to vector<8x32xf32>
    %329 = arith.addf %327, %328 : vector<8x32xf32>
    %330 = arith.negf %329 : vector<8x32xf32>
    %331 = math.exp %330 : vector<8x32xf32>
    %cst_124 = arith.constant 1.000000e+00 : f32
    %332 = vector.broadcast %cst_124 : f32 to vector<8x32xf32>
    %333 = arith.addf %332, %331 : vector<8x32xf32>
    %334 = arith.divf %332, %333 : vector<8x32xf32>
    %335 = vector.extract_strided_slice %326 {offsets = [0, 32], sizes = [8, 32], strides = [1, 1]} : vector<8x96xf32> to vector<8x32xf32>
    %336 = vector.extract_strided_slice %323 {offsets = [0, 32], sizes = [8, 32], strides = [1, 1]} : vector<8x96xf32> to vector<8x32xf32>
    %337 = arith.addf %335, %336 : vector<8x32xf32>
    %338 = arith.negf %337 : vector<8x32xf32>
    %339 = math.exp %338 : vector<8x32xf32>
    %cst_125 = arith.constant 1.000000e+00 : f32
    %340 = vector.broadcast %cst_125 : f32 to vector<8x32xf32>
    %341 = arith.addf %340, %339 : vector<8x32xf32>
    %342 = arith.divf %340, %341 : vector<8x32xf32>
    %343 = vector.extract_strided_slice %326 {offsets = [0, 64], sizes = [8, 32], strides = [1, 1]} : vector<8x96xf32> to vector<8x32xf32>
    %344 = vector.extract_strided_slice %323 {offsets = [0, 64], sizes = [8, 32], strides = [1, 1]} : vector<8x96xf32> to vector<8x32xf32>
    %345 = arith.mulf %334, %344 : vector<8x32xf32>
    %346 = arith.addf %343, %345 : vector<8x32xf32>
    %347 = math.tanh %346 : vector<8x32xf32>
    %cst_126 = arith.constant 1.000000e+00 : f32
    %348 = vector.broadcast %cst_126 : f32 to vector<8x32xf32>
    %349 = arith.subf %348, %342 : vector<8x32xf32>
    %350 = arith.mulf %349, %347 : vector<8x32xf32>
    %351 = arith.mulf %342, %318 : vector<8x32xf32>
    %352 = arith.addf %350, %351 : vector<8x32xf32>
    %353 = vector.broadcast %317 : i32 to vector<8x1xi32>
    %354 = arith.cmpi slt, %353, %3 : vector<8x1xi32>
    %355 = vector.shape_cast %354 : vector<8x1xi1> to vector<8x1xi1>
    %356 = vector.broadcast %355 : vector<8x1xi1> to vector<8x32xi1>
    %357 = arith.select %356, %352, %318 : vector<8x32xi1>, vector<8x32xf32>
    %c0_127 = arith.constant 0 : index
    %c0_128 = arith.constant 0 : index
    %358 = vector.load %arg12[%c0_127, %c0_128] : memref<8x32xf32, #tpu.memory_space<vmem>>, vector<8x32xf32>
    tpu.vector_store %arg12[%c0_127, %c0_128], %357 {strides = array<i32>} : memref<8x32xf32, #tpu.memory_space<vmem>>, vector<8x32xf32>,
    %cst_129 = arith.constant 0.000000e+00 : f32
    %359 = vector.shape_cast %354 : vector<8x1xi1> to vector<8x1xi1>
    %360 = vector.broadcast %359 : vector<8x1xi1> to vector<8x32xi1>
    %361 = vector.broadcast %cst_129 : f32 to vector<8x32xf32>
    %362 = arith.select %360, %357, %361 : vector<8x32xi1>, vector<8x32xf32>
    %363 = arith.index_cast %c3_i32_113 : i32 to index
    %c0_130 = arith.constant 0 : index
    %c0_131 = arith.constant 0 : index
    %364 = vector.load %arg8[%363, %c0_130, %c0_131] : memref<4x8x32xf32, #tpu.memory_space<vmem>>, vector<1x8x32xf32>
    %365 = vector.shape_cast %364 : vector<1x8x32xf32> to vector<8x32xf32>
    %366 = vector.shape_cast %362 : vector<8x32xf32> to vector<1x8x32xf32>
    tpu.vector_store %arg8[%363, %c0_130, %c0_131], %366 {strides = array<i32>} : memref<4x8x32xf32, #tpu.memory_space<vmem>>, vector<1x8x32xf32>,
    %c3_i32_132 = arith.constant 3 : i32
    %367 = arith.subi %c3_i32_132, %c3_i32_113 : i32
    %c4_i32_133 = arith.constant 4 : i32
    %368 = arith.muli %arg0, %c4_i32_133 : i32
    %369 = arith.addi %368, %c3_i32_113 : i32
    %c7_i32_134 = arith.constant 7 : i32
    %370 = arith.subi %c7_i32_134, %369 : i32
    %c0_135 = arith.constant 0 : index
    %c0_136 = arith.constant 0 : index
    %371 = vector.load %arg13[%c0_135, %c0_136] : memref<8x32xf32, #tpu.memory_space<vmem>>, vector<8x32xf32>
    %c0_137 = arith.constant 0 : index
    %c0_138 = arith.constant 0 : index
    %372 = vector.load %arg5[%c0_137, %c0_138] : memref<32x96xf32, #tpu.memory_space<vmem>>, vector<32x96xf32>
    %cst_139 = arith.constant dense<0.000000e+00> : vector<8x96xf32>
    %373 = tpu.matmul %371, %372, %cst_139 {dimension_numbers = #tpu.dot_dimension_numbers<[1], [0], [0], [1], [0, 0, 1, 1], [], []>} : vector<8x32xf32>, vector<32x96xf32>, vector<8x96xf32> -> vector<8x96xf32>
    %c0_140 = arith.constant 0 : index
    %c0_141 = arith.constant 0 : index
    %374 = vector.load %arg7[%c0_140, %c0_141] : memref<1x96xf32, #tpu.memory_space<vmem>>, vector<1x96xf32>
    %375 = vector.broadcast %374 : vector<1x96xf32> to vector<8x96xf32>
    %376 = arith.addf %373, %375 : vector<8x96xf32>
    %377 = arith.index_cast %367 : i32 to index
    %c0_142 = arith.constant 0 : index
    %c0_143 = arith.constant 0 : index
    %378 = vector.load %arg2[%377, %c0_142, %c0_143] : memref<4x8x96xf32, #tpu.memory_space<vmem>>, vector<1x8x96xf32>
    %379 = vector.shape_cast %378 : vector<1x8x96xf32> to vector<8x96xf32>
    %380 = vector.extract_strided_slice %379 {offsets = [0, 0], sizes = [8, 32], strides = [1, 1]} : vector<8x96xf32> to vector<8x32xf32>
    %381 = vector.extract_strided_slice %376 {offsets = [0, 0], sizes = [8, 32], strides = [1, 1]} : vector<8x96xf32> to vector<8x32xf32>
    %382 = arith.addf %380, %381 : vector<8x32xf32>
    %383 = arith.negf %382 : vector<8x32xf32>
    %384 = math.exp %383 : vector<8x32xf32>
    %cst_144 = arith.constant 1.000000e+00 : f32
    %385 = vector.broadcast %cst_144 : f32 to vector<8x32xf32>
    %386 = arith.addf %385, %384 : vector<8x32xf32>
    %387 = arith.divf %385, %386 : vector<8x32xf32>
    %388 = vector.extract_strided_slice %379 {offsets = [0, 32], sizes = [8, 32], strides = [1, 1]} : vector<8x96xf32> to vector<8x32xf32>
    %389 = vector.extract_strided_slice %376 {offsets = [0, 32], sizes = [8, 32], strides = [1, 1]} : vector<8x96xf32> to vector<8x32xf32>
    %390 = arith.addf %388, %389 : vector<8x32xf32>
    %391 = arith.negf %390 : vector<8x32xf32>
    %392 = math.exp %391 : vector<8x32xf32>
    %cst_145 = arith.constant 1.000000e+00 : f32
    %393 = vector.broadcast %cst_145 : f32 to vector<8x32xf32>
    %394 = arith.addf %393, %392 : vector<8x32xf32>
    %395 = arith.divf %393, %394 : vector<8x32xf32>
    %396 = vector.extract_strided_slice %379 {offsets = [0, 64], sizes = [8, 32], strides = [1, 1]} : vector<8x96xf32> to vector<8x32xf32>
    %397 = vector.extract_strided_slice %376 {offsets = [0, 64], sizes = [8, 32], strides = [1, 1]} : vector<8x96xf32> to vector<8x32xf32>
    %398 = arith.mulf %387, %397 : vector<8x32xf32>
    %399 = arith.addf %396, %398 : vector<8x32xf32>
    %400 = math.tanh %399 : vector<8x32xf32>
    %cst_146 = arith.constant 1.000000e+00 : f32
    %401 = vector.broadcast %cst_146 : f32 to vector<8x32xf32>
    %402 = arith.subf %401, %395 : vector<8x32xf32>
    %403 = arith.mulf %402, %400 : vector<8x32xf32>
    %404 = arith.mulf %395, %371 : vector<8x32xf32>
    %405 = arith.addf %403, %404 : vector<8x32xf32>
    %406 = vector.broadcast %370 : i32 to vector<8x1xi32>
    %407 = arith.cmpi slt, %406, %3 : vector<8x1xi32>
    %408 = vector.shape_cast %407 : vector<8x1xi1> to vector<8x1xi1>
    %409 = vector.broadcast %408 : vector<8x1xi1> to vector<8x32xi1>
    %410 = arith.select %409, %405, %371 : vector<8x32xi1>, vector<8x32xf32>
    %c0_147 = arith.constant 0 : index
    %c0_148 = arith.constant 0 : index
    %411 = vector.load %arg13[%c0_147, %c0_148] : memref<8x32xf32, #tpu.memory_space<vmem>>, vector<8x32xf32>
    tpu.vector_store %arg13[%c0_147, %c0_148], %410 {strides = array<i32>} : memref<8x32xf32, #tpu.memory_space<vmem>>, vector<8x32xf32>,
    %cst_149 = arith.constant 0.000000e+00 : f32
    %412 = vector.shape_cast %407 : vector<8x1xi1> to vector<8x1xi1>
    %413 = vector.broadcast %412 : vector<8x1xi1> to vector<8x32xi1>
    %414 = vector.broadcast %cst_149 : f32 to vector<8x32xf32>
    %415 = arith.select %413, %410, %414 : vector<8x32xi1>, vector<8x32xf32>
    %416 = arith.index_cast %367 : i32 to index
    %c0_150 = arith.constant 0 : index
    %c0_151 = arith.constant 0 : index
    %417 = vector.load %arg9[%416, %c0_150, %c0_151] : memref<4x8x32xf32, #tpu.memory_space<vmem>>, vector<1x8x32xf32>
    %418 = vector.shape_cast %417 : vector<1x8x32xf32> to vector<8x32xf32>
    %419 = vector.shape_cast %415 : vector<8x32xf32> to vector<1x8x32xf32>
    tpu.vector_store %arg9[%416, %c0_150, %c0_151], %419 {strides = array<i32>} : memref<4x8x32xf32, #tpu.memory_space<vmem>>, vector<1x8x32xf32>,
    %c4_i32_152 = arith.constant 4 : i32
    %c0_153 = arith.constant 0 : index
    %c0_154 = arith.constant 0 : index
    %420 = vector.load %arg12[%c0_153, %c0_154] : memref<8x32xf32, #tpu.memory_space<vmem>>, vector<8x32xf32>
    %c0_155 = arith.constant 0 : index
    %c0_156 = arith.constant 0 : index
    %421 = vector.load %arg10[%c0_155, %c0_156] : memref<8x32xf32, #tpu.memory_space<vmem>>, vector<8x32xf32>
    tpu.vector_store %arg10[%c0_155, %c0_156], %420 {strides = array<i32>} : memref<8x32xf32, #tpu.memory_space<vmem>>, vector<8x32xf32>,
    %c0_157 = arith.constant 0 : index
    %c0_158 = arith.constant 0 : index
    %422 = vector.load %arg13[%c0_157, %c0_158] : memref<8x32xf32, #tpu.memory_space<vmem>>, vector<8x32xf32>
    %c0_159 = arith.constant 0 : index
    %c0_160 = arith.constant 0 : index
    %423 = vector.load %arg11[%c0_159, %c0_160] : memref<8x32xf32, #tpu.memory_space<vmem>>, vector<8x32xf32>
    tpu.vector_store %arg11[%c0_159, %c0_160], %422 {strides = array<i32>} : memref<8x32xf32, #tpu.memory_space<vmem>>, vector<8x32xf32>,
    return
  }
  func.func @transform_0(%arg0: i32) -> (i32, i32, i32) {
    %c0_i32 = arith.constant 0 : i32
    %c0_i32_0 = arith.constant 0 : i32
    %c0_i32_1 = arith.constant 0 : i32
    return %arg0, %c0_i32, %c0_i32_0 : i32, i32, i32
  }
  func.func @transform_1(%arg0: i32) -> (i32, i32, i32) {
    %c1_i32 = arith.constant 1 : i32
    %0 = arith.subi %c1_i32, %arg0 : i32
    %c0_i32 = arith.constant 0 : i32
    %c0_i32_0 = arith.constant 0 : i32
    %c0_i32_1 = arith.constant 0 : i32
    return %0, %c0_i32, %c0_i32_0 : i32, i32, i32
  }
  func.func @transform_2(%arg0: i32) -> (i32, i32) {
    %c0_i32 = arith.constant 0 : i32
    %c0_i32_0 = arith.constant 0 : i32
    %c0_i32_1 = arith.constant 0 : i32
    return %c0_i32, %c0_i32_0 : i32, i32
  }
  func.func @transform_3(%arg0: i32) -> (i32, i32) {
    %c0_i32 = arith.constant 0 : i32
    %c0_i32_0 = arith.constant 0 : i32
    %c0_i32_1 = arith.constant 0 : i32
    return %c0_i32, %c0_i32_0 : i32, i32
  }
  func.func @transform_4(%arg0: i32) -> (i32, i32) {
    %c0_i32 = arith.constant 0 : i32
    %c0_i32_0 = arith.constant 0 : i32
    %c0_i32_1 = arith.constant 0 : i32
    return %c0_i32, %c0_i32_0 : i32, i32
  }
  func.func @transform_5(%arg0: i32) -> (i32, i32) {
    %c0_i32 = arith.constant 0 : i32
    %c0_i32_0 = arith.constant 0 : i32
    %c0_i32_1 = arith.constant 0 : i32
    return %c0_i32, %c0_i32_0 : i32, i32
  }
  func.func @transform_6(%arg0: i32) -> (i32, i32) {
    %c0_i32 = arith.constant 0 : i32
    %c0_i32_0 = arith.constant 0 : i32
    %c0_i32_1 = arith.constant 0 : i32
    return %c0_i32, %c0_i32_0 : i32, i32
  }
  func.func @transform_7(%arg0: i32) -> (i32, i32, i32) {
    %c0_i32 = arith.constant 0 : i32
    %c0_i32_0 = arith.constant 0 : i32
    %c0_i32_1 = arith.constant 0 : i32
    return %arg0, %c0_i32, %c0_i32_0 : i32, i32, i32
  }
  func.func @transform_8(%arg0: i32) -> (i32, i32, i32) {
    %c1_i32 = arith.constant 1 : i32
    %0 = arith.subi %c1_i32, %arg0 : i32
    %c0_i32 = arith.constant 0 : i32
    %c0_i32_0 = arith.constant 0 : i32
    %c0_i32_1 = arith.constant 0 : i32
    return %0, %c0_i32, %c0_i32_0 : i32, i32, i32
  }
  func.func @transform_9(%arg0: i32) -> (i32, i32) {
    %c0_i32 = arith.constant 0 : i32
    %c0_i32_0 = arith.constant 0 : i32
    %c0_i32_1 = arith.constant 0 : i32
    return %c0_i32, %c0_i32_0 : i32, i32
  }
  func.func @transform_10(%arg0: i32) -> (i32, i32) {
    %c0_i32 = arith.constant 0 : i32
    %c0_i32_0 = arith.constant 0 : i32
    %c0_i32_1 = arith.constant 0 : i32
    return %c0_i32, %c0_i32_0 : i32, i32
  }
}

module attributes {stable_mosaic.version = 11 : i64} {
  func.func @_linear_relu_kernel(%arg0: i32, %arg1: memref<32x64xf32, #tpu.memory_space<vmem>>, %arg2: memref<64x32xf32, #tpu.memory_space<vmem>>, %arg3: memref<32x32xf32, #tpu.memory_space<vmem>>) attributes {dimension_semantics = [#tpu.dimension_semantics<parallel>], iteration_bounds = array<i64: 1>, scalar_prefetch = 0 : i64, scratch_operands = 0 : i64, tpu.core_type = #tpu.core_type<tc>, window_params = [{transform_indices = @transform_0, window_bounds = array<i64: 32, 64>}, {pipeline_mode = #tpu.pipeline_mode<synchronous>, transform_indices = @transform_1, window_bounds = array<i64: 64, 32>}, {transform_indices = @transform_2, window_bounds = array<i64: 32, 32>}]} {
    %c0 = arith.constant 0 : index
    %c0_0 = arith.constant 0 : index
    %0 = vector.load %arg1[%c0, %c0_0] : memref<32x64xf32, #tpu.memory_space<vmem>>, vector<32x64xf32>
    %c0_1 = arith.constant 0 : index
    %c0_2 = arith.constant 0 : index
    %1 = vector.load %arg2[%c0_1, %c0_2] : memref<64x32xf32, #tpu.memory_space<vmem>>, vector<64x32xf32>
    %cst = arith.constant dense<0.000000e+00> : vector<32x32xf32>
    %2 = tpu.matmul %0, %1, %cst {dimension_numbers = #tpu.dot_dimension_numbers<[1], [0], [0], [1], [0, 0, 1, 1], [], []>} : vector<32x64xf32>, vector<64x32xf32>, vector<32x32xf32> -> vector<32x32xf32>
    %cst_3 = arith.constant 0.000000e+00 : f32
    %3 = vector.broadcast %cst_3 : f32 to vector<32x32xf32>
    %4 = arith.maximumf %2, %3 : vector<32x32xf32>
    %c0_4 = arith.constant 0 : index
    %c0_5 = arith.constant 0 : index
    %5 = vector.load %arg3[%c0_4, %c0_5] : memref<32x32xf32, #tpu.memory_space<vmem>>, vector<32x32xf32>
    tpu.vector_store %arg3[%c0_4, %c0_5], %4 {strides = array<i32>} : memref<32x32xf32, #tpu.memory_space<vmem>>, vector<32x32xf32>,
    return
  }
  func.func @transform_0(%arg0: i32) -> (i32, i32) {
    %c0_i32 = arith.constant 0 : i32
    %c0_i32_0 = arith.constant 0 : i32
    return %arg0, %c0_i32 : i32, i32
  }
  func.func @transform_1(%arg0: i32) -> (i32, i32) {
    %c0_i32 = arith.constant 0 : i32
    %c0_i32_0 = arith.constant 0 : i32
    %c0_i32_1 = arith.constant 0 : i32
    return %c0_i32, %c0_i32_0 : i32, i32
  }
  func.func @transform_2(%arg0: i32) -> (i32, i32) {
    %c0_i32 = arith.constant 0 : i32
    %c0_i32_0 = arith.constant 0 : i32
    return %arg0, %c0_i32 : i32, i32
  }
}

module attributes {stable_mosaic.version = 11 : i64} {
  func.func @_linear_relu_kernel(%arg0: i32, %arg1: memref<4x64xf32, #tpu.memory_space<vmem>>, %arg2: memref<64x32xf32, #tpu.memory_space<vmem>>, %arg3: memref<4x32xf32, #tpu.memory_space<vmem>>) attributes {dimension_semantics = [#tpu.dimension_semantics<parallel>], iteration_bounds = array<i64: 1>, scalar_prefetch = 0 : i64, scratch_operands = 0 : i64, tpu.core_type = #tpu.core_type<tc>, window_params = [{transform_indices = @transform_0, window_bounds = array<i64: 4, 64>}, {pipeline_mode = #tpu.pipeline_mode<synchronous>, transform_indices = @transform_1, window_bounds = array<i64: 64, 32>}, {transform_indices = @transform_2, window_bounds = array<i64: 4, 32>}]} {
    %c0 = arith.constant 0 : index
    %c0_0 = arith.constant 0 : index
    %0 = vector.load %arg1[%c0, %c0_0] : memref<4x64xf32, #tpu.memory_space<vmem>>, vector<4x64xf32>
    %c0_1 = arith.constant 0 : index
    %c0_2 = arith.constant 0 : index
    %1 = vector.load %arg2[%c0_1, %c0_2] : memref<64x32xf32, #tpu.memory_space<vmem>>, vector<64x32xf32>
    %cst = arith.constant dense<0.000000e+00> : vector<4x32xf32>
    %2 = tpu.matmul %0, %1, %cst {dimension_numbers = #tpu.dot_dimension_numbers<[1], [0], [0], [1], [0, 0, 1, 1], [], []>} : vector<4x64xf32>, vector<64x32xf32>, vector<4x32xf32> -> vector<4x32xf32>
    %cst_3 = arith.constant 0.000000e+00 : f32
    %3 = vector.broadcast %cst_3 : f32 to vector<4x32xf32>
    %4 = arith.maximumf %2, %3 : vector<4x32xf32>
    %c0_4 = arith.constant 0 : index
    %c0_5 = arith.constant 0 : index
    %5 = vector.load %arg3[%c0_4, %c0_5] : memref<4x32xf32, #tpu.memory_space<vmem>>, vector<4x32xf32>
    tpu.vector_store %arg3[%c0_4, %c0_5], %4 {strides = array<i32>} : memref<4x32xf32, #tpu.memory_space<vmem>>, vector<4x32xf32>,
    return
  }
  func.func @transform_0(%arg0: i32) -> (i32, i32) {
    %c0_i32 = arith.constant 0 : i32
    %c0_i32_0 = arith.constant 0 : i32
    return %arg0, %c0_i32 : i32, i32
  }
  func.func @transform_1(%arg0: i32) -> (i32, i32) {
    %c0_i32 = arith.constant 0 : i32
    %c0_i32_0 = arith.constant 0 : i32
    %c0_i32_1 = arith.constant 0 : i32
    return %c0_i32, %c0_i32_0 : i32, i32
  }
  func.func @transform_2(%arg0: i32) -> (i32, i32) {
    %c0_i32 = arith.constant 0 : i32
    %c0_i32_0 = arith.constant 0 : i32
    return %arg0, %c0_i32 : i32, i32
  }
}

</mosaic_0001>

<bundles_post_ra>
// kernel: sentence_encoder_rnn_forward.7
= control target key start
LH: loop header
LB: loop body
LE: loop exit
PB: predicated region body
PF: predicated region fallthrough
CT: control target
= control target key end

     0   :  { %v181_v3 = vmov 0.0|0.0   ;;  %vm182_vm0 = vmmov 0   ;;  %v183_v6 = vmov 0.0   ;;  %s239_s0 = inlined_call_operand.vmem [shape: f32[4,64], index: 0, kind: input, shape index: {}]   ;;  %s240_s1 = inlined_call_operand.vmem [shape: f32[64,32], index: 1, kind: input, shape index: {}]   ;;  %s241_s2 = inlined_call_operand.hbm [shape: f32[4,32], index: 2, kind: output, shape index: {}]  }
   0x1   :  { %v13_v0 = vld [vmem:[%s240_s1] sm:$0xff]  ;;  %v14_v1 = vld [vmem:[%s240_s1 + $0x8] sm:$0xff]  ;;  %v15_v2 = vld [vmem:[%s240_s1 + $0x10] sm:$0xff]  ;;  %141 = vmatprep.subr.bf16.mxu0 %v181_v3  ;;  %138 = vmatprep.mubr.msk.f32.mxu0 %vm182_vm0, %v183_v6 }
   0x2   :  { %v142_v4 = vpack.c.bf16 %v14_v1, %v13_v0  ;;  %v16_v5 = vld [vmem:[%s240_s1 + $0x18] sm:$0xff] }
   0x3   :  { %v145_v7 = vpack.c.bf16 %v16_v5, %v15_v2 }
   0x4   :  { %143 = vmatpush3.bf16.msra.mxu0 %v142_v4 }
   0x5   :  { %7 = vsyncpa [#allocation3], 0  ;;  %144 = vmatprep.subr.bf16.mxu0 %v181_v3  ;;  %v17_v8 = vld [vmem:[%s240_s1 + $0x20] sm:$0xff]  ;;  %v18_v9 = vld [vmem:[%s240_s1 + $0x28] sm:$0xff]  ;;  %vm21_vm1 = vcmask 523264   ;;  %s184_s27 = smov [#allocation2]  }
   0x6   :  { %v148_v10 = vpack.c.bf16 %v18_v9, %v17_v8  ;;  %v19_v11 = vld [vmem:[%s240_s1 + $0x30] sm:$0xff]  ;;  %v20_v12 = vld [vmem:[%s240_s1 + $0x38] sm:$0xff]  ;;  %v12_v14 = vld [vmem:[%s239_s0] sm:$0xf]  ;;  %s104_s28 = sshll.u32 %s184_s27, 4  ;;  %vm96_vm2 = vcmask 257024   ;;  %s105_s28 = int_to_ptr.vmem [resolvable:$true] %s104_s28 }
   0x7   :  { %v151_v13 = vpack.c.bf16 %v20_v12, %v19_v11  ;;  %s157_s29 = scalar_lea.vmem %s105_s28, 64  ;;  %p162_p1 = scmp.lt.s32.totalorder %s105_s28, %s105_s28 }
   0x8   :  { %146 = vmatpush3.bf16.msra.mxu0 %v145_v7  ;;  %p158_p0 = scmp.ne.s32.totalorder %s105_s28, %s157_s29  ;;  %p163_p2 = scmp.lt.s32.totalorder %s157_s29, %s157_s29 }
   0x9   :  { %147 = vmatprep.subr.bf16.mxu0 %v181_v3 }
   0xa   :  { %p164_p3 = por %p163_p2, %p162_p1 }
   0xc   :  { %149 = vmatpush3.bf16.msra.mxu0 %v148_v10  ;;  %p165_p4 = pnand %p164_p3, %p158_p0 }
   0xd   :  { %150 = vmatprep.subr.bf16.mxu0 %v181_v3 }
  0x10   :  { %152 = vmatpush3.bf16.msra.mxu0 %v151_v13 }
  0x13   :  { %139 = vmatmul.mubr.msk.f32.vlgmr.msra.gmra.mrb[0].mxu0 %vm21_vm1, %v12_v14 }
  0xe6   :  { %v91_v15 = vpop.f32.mrb[0].mxu0 }
  0xe7   :  { %v95_v16 = vmax.f32 %v91_v15, 0.0  ;;  %v140_v17 = vpop.f32.mrb[1].mxu0 }
  0xe9   :  { %97 = vst.msk [vmem:[#allocation2] sm:$0xf] %vm96_vm2, %v95_v16 }
  0xea   :  { %168 = shalt.err (!%p165_p4)
}
  0xeb   :  { %s169_s0 = scalar_lea.hbm %s241_s2, 64 }
  0xec   :  { %p170_p5 = scmp.ne.s32.totalorder %s241_s2, %s169_s0  ;;  %p173_p6 = scmp.lt.u32.totalorder %s169_s0, %s241_s2 }
  0xee   :  { %p175_p7 = pnand %p173_p6, %p170_p5 }
  0xf0   :  { %178 = shalt.err (!%p175_p7)
}
  0xf1   :  { %107 = dma.vmem_to_hbm [thread:$0]  %s105_s28, 64, %s241_s2, [#allocation3]  }
  0xf2   :  { %179 = dma.done.wait [#allocation3], 64  }
  0xf3   :  { %180 = vsyncadd [#allocation3], 4294967232 }
  0xf4   :  { %111 = vsyncpa [#allocation3], 1 }

// kernel: sentence_encoder_rnn_forward.6
= control target key start
LH: loop header
LB: loop body
LE: loop exit
PB: predicated region body
PF: predicated region fallthrough
CT: control target
= control target key end

     0   :  { %vm23_vm0 = vcmask 523264   ;;  %vm125_vm1 = vcmask 261120   ;;  %s263_s1 = inlined_call_operand.vmem [shape: f32[64,32], index: 1, kind: input, shape index: {}]   ;;  %s264_s0 = inlined_call_operand.vmem [shape: f32[32,64], index: 0, kind: input, shape index: {}]   ;;  %s265_s2 = inlined_call_operand.vmem [shape: f32[32,32], index: 2, kind: output, shape index: {}]  }
   0x1   :  { %v15_v0 = vld [vmem:[%s263_s1] sm:$0xff]  ;;  %v16_v1 = vld [vmem:[%s263_s1 + $0x8] sm:$0xff]  ;;  %v17_v2 = vld [vmem:[%s263_s1 + $0x10] sm:$0xff] }
   0x2   :  { %v172_v3 = vpack.c.bf16 %v16_v1, %v15_v0  ;;  %v18_v4 = vld [vmem:[%s263_s1 + $0x18] sm:$0xff]  ;;  %v19_v6 = vld [vmem:[%s263_s1 + $0x20] sm:$0xff]  ;;  %v20_v7 = vld [vmem:[%s263_s1 + $0x28] sm:$0xff] }
   0x3   :  { %v176_v5 = vpack.c.bf16 %v18_v4, %v17_v2  ;;  %v11_v8 = vld [vmem:[%s264_s0] sm:$0xff]  ;;  %v13_v9 = vld [vmem:[%s264_s0 + $0x10] sm:$0xff]  ;;  %v180_v10 = vpack.c.bf16 %v20_v7, %v19_v6  ;;  %v22_v12 = vld [vmem:[%s263_s1 + $0x38] sm:$0xff] }
   0x4   :  { %173 = vmatprep.subr.bf16.mxu0 %v172_v3  ;;  %188 = vmatprep.subr.bf16.mxu1 %v172_v3  ;;  %v21_v11 = vld [vmem:[%s263_s1 + $0x30] sm:$0xff]  ;;  %v12_v14 = vld [vmem:[%s264_s0 + $0x8] sm:$0xff]  ;;  %v14_v15 = vld [vmem:[%s264_s0 + $0x18] sm:$0xff] }
   0x5   :  { %175 = vmatpush3.bf16.msra.mxu0 %v172_v3  ;;  %192 = vmatpush3.bf16.msra.mxu1 %v172_v3  ;;  %v184_v13 = vpack.c.bf16 %v22_v12, %v21_v11 }
   0x6   :  { %177 = vmatprep.subr.bf16.mxu0 %v176_v5  ;;  %189 = vmatprep.subr.bf16.mxu1 %v176_v5 }
   0x7   :  { %166 = vmatprep.mubr.msk.f32.mxu0 %vm23_vm0, %v11_v8  ;;  %169 = vmatprep.mubr.msk.f32.mxu1 %vm23_vm0, %v13_v9 }
   0x9   :  { %179 = vmatpush3.bf16.msra.mxu0 %v176_v5  ;;  %193 = vmatpush3.bf16.msra.mxu1 %v176_v5 }
   0xa   :  { %181 = vmatprep.subr.bf16.mxu0 %v180_v10  ;;  %190 = vmatprep.subr.bf16.mxu1 %v180_v10 }
   0xd   :  { %183 = vmatpush3.bf16.msra.mxu0 %v180_v10  ;;  %194 = vmatpush3.bf16.msra.mxu1 %v180_v10 }
   0xe   :  { %185 = vmatprep.subr.bf16.mxu0 %v184_v13  ;;  %191 = vmatprep.subr.bf16.mxu1 %v184_v13 }
  0x11   :  { %187 = vmatpush3.bf16.msra.mxu0 %v184_v13  ;;  %195 = vmatpush3.bf16.msra.mxu1 %v184_v13 }
  0x14   :  { %167 = vmatmul.mubr.msk.f32.vlgmr.msra.gmra.mrb[0].mxu0 %vm23_vm0, %v12_v14  ;;  %170 = vmatmul.mubr.msk.f32.vlgmr.msra.gmra.mrb[0].mxu1 %vm23_vm0, %v14_v15 }
  0xe7   :  { %v168_v16 = vpop.f32.mrb[0].mxu0  ;;  %v171_v17 = vpop.f32.mrb[0].mxu1 }
  0xe8   :  { %v122_v18 = vmax.f32 %v168_v16, 0.0  ;;  %v124_v19 = vmax.f32 %v171_v17, 0.0  ;;  %v102_v20 = vpop.f32.mrb[1].mxu0  ;;  %v112_v21 = vpop.f32.mrb[1].mxu1 }
  0xe9   :  { %v121_v22 = vmax.f32 %v102_v20, 0.0  ;;  %v123_v23 = vmax.f32 %v112_v21, 0.0 }
  0xea   :  { %127 = vst.msk [vmem:[%s265_s2 + $0x8] sm:$0xff] %vm125_vm1, %v122_v18  ;;  %129 = vst.msk [vmem:[%s265_s2 + $0x18] sm:$0xff] %vm125_vm1, %v124_v19 }
  0xeb   :  { %126 = vst.msk [vmem:[%s265_s2] sm:$0xff] %vm125_vm1, %v121_v22  ;;  %128 = vst.msk [vmem:[%s265_s2 + $0x10] sm:$0xff] %vm125_vm1, %v123_v23 }

// kernel: sentence_encoder_rnn_forward.4
= control target key start
LH: loop header
LB: loop body
LE: loop exit
PB: predicated region body
PF: predicated region fallthrough
CT: control target
= control target key end

     0   :  { %vm41_vm0 = vcmask 261120   ;;  %vm171_vm1 = vcmask 785408   ;;  %s579_s1 = inlined_call_operand.vmem [shape: f32[32,96], index: 1, kind: input, shape index: {}]   ;;  %s580_s2 = inlined_call_operand.vmem [shape: f32[32,96], index: 2, kind: input, shape index: {}]   ;;  %s581_s0 = inlined_call_operand.vmem [shape: f32[64,32], index: 0, kind: input, shape index: {}]   ;;  %s582_s3 = inlined_call_operand.vmem [shape: f32[1,96], index: 3, kind: input, shape index: {}]   ;;  %s583_s4 = inlined_call_operand.vmem [shape: f32[1,96], index: 4, kind: input, shape index: {}]   ;;  %s584_s5 = inlined_call_operand.vmem [shape: f32[64,96], index: 5, kind: output, shape index: {0}]   ;;  %s585_s6 = inlined_call_operand.vmem [shape: f32[64,96], index: 6, kind: output, shape index: {1}]  }
   0x1   :  { %v30_v0 = vld [vmem:[%s579_s1] sm:$0xff]  ;;  %v31_v1 = vld [vmem:[%s579_s1 + $0x8] sm:$0xff]  ;;  %v32_v5 = vld [vmem:[%s579_s1 + $0x10] sm:$0xff] }
   0x2   :  { %v180_v2 = vld [vmem:[%s580_s2] sm:$0xff]  ;;  %v394_v3 = vpack.c.bf16 %v31_v1, %v30_v0  ;;  %v181_v4 = vld [vmem:[%s580_s2 + $0x8] sm:$0xff]  ;;  %v33_v6 = vld [vmem:[%s579_s1 + $0x18] sm:$0xff] }
   0x3   :  { %v402_v7 = vpack.c.bf16 %v181_v4, %v180_v2  ;;  %v398_v8 = vpack.c.bf16 %v33_v6, %v32_v5  ;;  %v182_v9 = vld [vmem:[%s580_s2 + $0x10] sm:$0xff]  ;;  %v183_v10 = vld [vmem:[%s580_s2 + $0x18] sm:$0xff]  ;;  %v22_v11 = vld [vmem:[%s581_s0] sm:$0xff] }
   0x4   :  { %395 = vmatprep.subr.bf16.mxu0 %v394_v3  ;;  %v406_v12 = vpack.c.bf16 %v183_v10, %v182_v9  ;;  %362 = vmatprep.mubr.msk.f32.mxu0 %vm41_vm0, %v22_v11  ;;  %v23_v13 = vld [vmem:[%s581_s0 + $0x8] sm:$0xff]  ;;  %v24_v14 = vld [vmem:[%s581_s0 + $0x10] sm:$0xff]  ;;  %v25_v15 = vld [vmem:[%s581_s0 + $0x18] sm:$0xff] }
   0x5   :  { %403 = vmatprep.subr.bf16.mxu1 %v402_v7  ;;  %397 = vmatpush3.bf16.msra.mxu0 %v394_v3  ;;  %v26_v16 = vld [vmem:[%s581_s0 + $0x20] sm:$0xff]  ;;  %v27_v17 = vld [vmem:[%s581_s0 + $0x28] sm:$0xff]  ;;  %v28_v18 = vld [vmem:[%s581_s0 + $0x30] sm:$0xff] }
   0x6   :  { %405 = vmatpush3.bf16.msra.mxu1 %v402_v7  ;;  %399 = vmatprep.subr.bf16.mxu0 %v398_v8  ;;  %v29_v19 = vld [vmem:[%s581_s0 + $0x38] sm:$0xff]  ;;  %v312_v20 = vld [vmem:[%s582_s3] ss:$0 sm:$0xff] }
   0x7   :  { %407 = vmatprep.subr.bf16.mxu1 %v406_v12  ;;  %382 = vmatprep.mubr.msk.f32.mxu1 %vm41_vm0, %v22_v11  ;;  %v321_v21 = vld [vmem:[%s583_s4] ss:$0 sm:$0xff] }
   0x9   :  { %401 = vmatpush3.bf16.msra.mxu0 %v398_v8 }
   0xa   :  { %409 = vmatpush3.bf16.msra.mxu1 %v406_v12 }
   0xc   :  { %363 = vmatmul.mubr.msk.f32.vlgmr.msra.gmra.mrb[0].mxu0 %vm41_vm0, %v23_v13 }
   0xd   :  { %383 = vmatmul.mubr.msk.f32.vlgmr.msra.gmra.mrb[0].mxu1 %vm41_vm0, %v23_v13  ;;  %365 = vmatprep.mubr.msk.f32.mxu0 %vm41_vm0, %v24_v14 }
   0xe   :  { %385 = vmatprep.mubr.msk.f32.mxu1 %vm41_vm0, %v24_v14 }
  0x10   :  { %366 = vmatmul.mubr.msk.f32.gmra.mrb[2].mxu0 %vm41_vm0, %v25_v15 }
  0x11   :  { %386 = vmatmul.mubr.msk.f32.gmra.mrb[2].mxu1 %vm41_vm0, %v25_v15  ;;  %368 = vmatprep.mubr.msk.f32.mxu0 %vm41_vm0, %v26_v16 }
  0x12   :  { %388 = vmatprep.mubr.msk.f32.mxu1 %vm41_vm0, %v26_v16 }
  0x14   :  { %369 = vmatmul.mubr.msk.f32.gmra.mrb[4].mxu0 %vm41_vm0, %v27_v17 }
  0x15   :  { %389 = vmatmul.mubr.msk.f32.gmra.mrb[4].mxu1 %vm41_vm0, %v27_v17  ;;  %371 = vmatprep.mubr.msk.f32.mxu0 %vm41_vm0, %v28_v18 }
  0x16   :  { %391 = vmatprep.mubr.msk.f32.mxu1 %vm41_vm0, %v28_v18 }
  0x18   :  { %372 = vmatmul.mubr.msk.f32.gmra.mrb[6].mxu0 %vm41_vm0, %v29_v19 }
  0x19   :  { %392 = vmatmul.mubr.msk.f32.gmra.mrb[6].mxu1 %vm41_vm0, %v29_v19 }
  0xdf   :  { %v364_v22 = vpop.f32.mrb[0].mxu0 }
  0xe0   :  { %v138_v23 = vadd.f32 %v364_v22, %v312_v20  ;;  %v384_v24 = vpop.f32.mrb[0].mxu1  ;;  %v132_v25 = vpop.f32.mrb[1].mxu0 }
  0xe1   :  { %v263_v26 = vadd.f32 %v384_v24, %v321_v21  ;;  %v133_v27 = vadd.f32 %v312_v20, %v132_v25  ;;  %v257_v28 = vpop.f32.mrb[1].mxu1 }
  0xe2   :  { %173 = vst.msk [vmem:[%s584_s5 + $0x8] sm:$0xff] %vm171_vm1, %v138_v23  ;;  %v258_v29 = vadd.f32 %v321_v21, %v257_v28 }
  0xe3   :  { %297 = vst.msk [vmem:[%s585_s6 + $0x8] sm:$0xff] %vm171_vm1, %v263_v26  ;;  %172 = vst.msk [vmem:[%s584_s5] sm:$0xff] %vm171_vm1, %v133_v27  ;;  %v367_v30 = vpop.f32.mrb[2].mxu0 }
  0xe4   :  { %296 = vst.msk [vmem:[%s585_s6] sm:$0xff] %vm171_vm1, %v258_v29  ;;  %v148_v31 = vadd.f32 %v367_v30, %v312_v20  ;;  %v387_v32 = vpop.f32.mrb[2].mxu1  ;;  %v142_v33 = vpop.f32.mrb[3].mxu0 }
  0xe5   :  { %v273_v34 = vadd.f32 %v387_v32, %v321_v21  ;;  %v143_v35 = vadd.f32 %v312_v20, %v142_v33  ;;  %v267_v36 = vpop.f32.mrb[3].mxu1 }
  0xe6   :  { %175 = vst.msk [vmem:[%s584_s5 + $0x18] sm:$0xff] %vm171_vm1, %v148_v31  ;;  %v268_v37 = vadd.f32 %v321_v21, %v267_v36 }
  0xe7   :  { %299 = vst.msk [vmem:[%s585_s6 + $0x18] sm:$0xff] %vm171_vm1, %v273_v34  ;;  %174 = vst.msk [vmem:[%s584_s5 + $0x10] sm:$0xff] %vm171_vm1, %v143_v35  ;;  %v370_v38 = vpop.f32.mrb[4].mxu0 }
  0xe8   :  { %298 = vst.msk [vmem:[%s585_s6 + $0x10] sm:$0xff] %vm171_vm1, %v268_v37  ;;  %v158_v39 = vadd.f32 %v370_v38, %v312_v20  ;;  %v390_v40 = vpop.f32.mrb[4].mxu1  ;;  %v152_v41 = vpop.f32.mrb[5].mxu0 }
  0xe9   :  { %v283_v42 = vadd.f32 %v390_v40, %v321_v21  ;;  %v153_v43 = vadd.f32 %v312_v20, %v152_v41  ;;  %v277_v44 = vpop.f32.mrb[5].mxu1 }
  0xea   :  { %177 = vst.msk [vmem:[%s584_s5 + $0x28] sm:$0xff] %vm171_vm1, %v158_v39  ;;  %v278_v45 = vadd.f32 %v321_v21, %v277_v44 }
  0xeb   :  { %301 = vst.msk [vmem:[%s585_s6 + $0x28] sm:$0xff] %vm171_vm1, %v283_v42  ;;  %176 = vst.msk [vmem:[%s584_s5 + $0x20] sm:$0xff] %vm171_vm1, %v153_v43  ;;  %v373_v46 = vpop.f32.mrb[6].mxu0 }
  0xec   :  { %300 = vst.msk [vmem:[%s585_s6 + $0x20] sm:$0xff] %vm171_vm1, %v278_v45  ;;  %v168_v47 = vadd.f32 %v373_v46, %v312_v20  ;;  %v393_v48 = vpop.f32.mrb[6].mxu1  ;;  %v162_v49 = vpop.f32.mrb[7].mxu0 }
  0xed   :  { %v293_v50 = vadd.f32 %v393_v48, %v321_v21  ;;  %v163_v51 = vadd.f32 %v312_v20, %v162_v49  ;;  %v287_v52 = vpop.f32.mrb[7].mxu1 }
  0xee   :  { %179 = vst.msk [vmem:[%s584_s5 + $0x38] sm:$0xff] %vm171_vm1, %v168_v47  ;;  %v288_v53 = vadd.f32 %v321_v21, %v287_v52 }
  0xef   :  { %303 = vst.msk [vmem:[%s585_s6 + $0x38] sm:$0xff] %vm171_vm1, %v293_v50  ;;  %178 = vst.msk [vmem:[%s584_s5 + $0x30] sm:$0xff] %vm171_vm1, %v163_v51 }
  0xf0   :  { %302 = vst.msk [vmem:[%s585_s6 + $0x30] sm:$0xff] %vm171_vm1, %v288_v53 }

// kernel: sentence_encoder_rnn_forward.5
= control target key start
LH: loop header
LB: loop body
LE: loop exit
PB: predicated region body
PF: predicated region fallthrough
CT: control target
= control target key end

     0   :  { %s1993_s13 = smov 0   ;;  %s2271_s0 = inlined_call_operand.vmem [shape: f32[8,8,96], index: 0, kind: input, shape index: {}]   ;;  %s2272_s1 = inlined_call_operand.vmem [shape: f32[8,8,96], index: 1, kind: input, shape index: {}]   ;;  %s2273_s2 = inlined_call_operand.vmem [shape: s32[8,1], index: 2, kind: input, shape index: {}]   ;;  %s2274_s3 = inlined_call_operand.vmem [shape: f32[32,96], index: 3, kind: input, shape index: {}]   ;;  %s2275_s4 = inlined_call_operand.vmem [shape: f32[32,96], index: 4, kind: input, shape index: {}]   ;;  %s2276_s5 = inlined_call_operand.vmem [shape: f32[1,96], index: 5, kind: input, shape index: {}]   ;;  %s2277_s6 = inlined_call_operand.vmem [shape: f32[1,96], index: 6, kind: input, shape index: {}]   ;;  %s2278_s7 = inlined_call_operand.vmem [shape: f32[8,8,32], index: 7, kind: output, shape index: {0}]   ;;  %s2279_s8 = inlined_call_operand.vmem [shape: f32[8,8,32], index: 8, kind: output, shape index: {1}]   ;;  %s2280_s9 = inlined_call_operand.vmem [shape: f32[8,32], index: 9, kind: output, shape index: {2}]   ;;  %s2281_s10 = inlined_call_operand.vmem [shape: f32[8,32], index: 10, kind: output, shape index: {3}]  }
   0x1 LB: > { %s1627_s14 = sadd.s32 4294967295, %s1928_s13   ;;  %p1631_p0 = scmp.ge.s32.totalorder %s1928_s13, 1  ;;  %s1928_s13 = sphi %s1993_s13, %s21_s13  }
   0x2   : > { %p327_p1 = scmp.lt.s32.totalorder %s1928_s13, 3 }
   0x4   : > { %p328_p2 = pnand %p1631_p0, %p327_p1 }
   0x5   : > { %s2001_s15 = sshll.u32 (!%p328_p2), %s1627_s14, 2  ;;  %s383_s16 = ssub.s32 (!%p328_p2), 1, %s1627_s14 }
   0x6   : > { %331 = sbr.rel (%p328_p2) target bundleno = 2844 (0xb1c), region = 48  ;;  %p378_p3 = scmp.lt.s32.totalorder (!%p328_p2), %s2001_s15, 7 }
   0x7   : > { %s1634_s17 = sshll.u32 (!%p328_p2), %s383_s16, 2  ;;  %p1640_p5 = scmp.ne.s32.totalorder (!%p328_p2), %s1627_s14, 0 }
   0x8   : > { %p385_p4 = scmp.lt.s32.totalorder (!%p328_p2), %s1634_s17, 7 }
   0xd   : > { %s379_s18 = scalar_select %p378_p3, %s2001_s15, 7 }
   0xe   : > { %s2283_s17 = smov (!%p385_p4, %s1634_s17), 7  ;;  %408 = sbr.rel (%p1640_p5) target bundleno = 21 (0x15), region = 52 }
   0xf   : > { %s1633_s19 = sshll.u32 %s379_s18, 3  ;;  %s1635_s23 = sshll.u32 %s2283_s17, 3  ;;  %vm409_vm0 = vcmask (!%p1640_p5), 261120   ;;  %v1930_v0 = vmov (!%p1640_p5), 0.0  }
  0x10   : > { %s2008_s22 = scalar_lea.vmem %s2271_s0, %s1633_s19  ;;  %s2013_s26 = scalar_lea.vmem %s2272_s1, %s1635_s23  ;;  %410 = vst.msk [vmem:[#allocation2] sm:$0xff] (!%p1640_p5), %vm409_vm0, %v1930_v0  ;;  %411 = vst.msk [vmem:[#allocation3] sm:$0xff] (!%p1640_p5), %vm409_vm0, %v1930_v0 }
  0x11   : > { %s2018_s29 = scalar_lea.vmem %s2278_s7, %s1633_s19  ;;  %s2023_s12 = scalar_lea.vmem %s2279_s8, %s1635_s23 }
  0x15 PF: > { %v415_v1 = vld [vmem:[%s2274_s3] sm:$0xff]  ;;  %v416_v2 = vld [vmem:[%s2274_s3 + $0x8] sm:$0xff]  ;;  %v1931_v4 = vmov 0.0|0.0   ;;  %v417_v7 = vld [vmem:[%s2274_s3 + $0x10] sm:$0xff]  ;;  %vm1932_vm1 = vmmov 0   ;;  %v1933_v10 = vmov 0.0   ;;  %v530_v26 = vstv %s2001_s15 }
  0x16   : > { %v551_v3 = vld [vmem:[%s2275_s4] sm:$0xff]  ;;  %1808 = vmatprep.subr.bf16.mxu0 %v1931_v4  ;;  %v2035_v5 = vpack.c.bf16 %v416_v2, %v415_v1  ;;  %1814 = vmatprep.subr.bf16.mxu1 %v1931_v4  ;;  %v552_v6 = vld [vmem:[%s2275_s4 + $0x8] sm:$0xff]  ;;  %v418_v8 = vld [vmem:[%s2274_s3 + $0x18] sm:$0xff]  ;;  %vm426_vm2 = vcmask 261120   ;;  %v1934_v17 = vmov 0   ;;  %s1935_s24 = smov 64  }
  0x17   : > { %v2047_v9 = vpack.c.bf16 %v552_v6, %v551_v3  ;;  %1728 = vmatprep.mubr.msk.f32.mxu0 %vm1932_vm1, %v1933_v10  ;;  %v553_v11 = vld [vmem:[%s2275_s4 + $0x10] sm:$0xff]  ;;  %v554_v12 = vld [vmem:[%s2275_s4 + $0x18] sm:$0xff]  ;;  %1739 = vmatprep.mubr.msk.f32.mxu1 %vm1932_vm1, %v1933_v10  ;;  %v2060_v13 = vpack.c.bf16 %v418_v8, %v417_v7  ;;  %v414_v15 = vld [vmem:[#allocation2] sm:$0xff]  ;;  %s1936_s25 = smov 32   ;;  %s549_s27 = ssub.s32 7, %s2001_s15 }
  0x18   : > { %1810 = vmatpush3.bf16.msra.mxu0 %v2035_v5  ;;  %v2064_v14 = vpack.c.bf16 %v554_v12, %v553_v11  ;;  %v550_v16 = vld [vmem:[#allocation3] sm:$0xff]  ;;  %1872 = vset.pattern.permute.xlu0 %v1934_v17  ;;  %v2090_v18 = vld [vmem:[%s2276_s5] ss:$0 sm:$0xff]  ;;  %v1647_v31 = vld [vmem:[%s2013_s26 + $0x18] sm:$0xff]  ;;  %v666_v42 = vstv %s549_s27  ;;  %s1937_s28 = smov 96   ;;  %s686_s30 = sadd.s32 1, %s2001_s15 }
  0x19   : > { %1811 = vmatprep.subr.bf16.mxu0 %v1931_v4  ;;  %1816 = vmatpush3.bf16.msra.mxu1 %v2047_v9  ;;  %v2095_v20 = vld [vmem:[%s2277_s6] ss:$0 sm:$0xff]  ;;  %s823_s11 = ssub.s32 6, %s2001_s15  ;;  %s960_s16 = sadd.s32 2, %s2001_s15 }
  0x1a   : > { %1817 = vmatprep.subr.bf16.mxu1 %v1931_v4  ;;  %1873 = vset.pattern.permute.xlu1 %v1934_v17  ;;  %v2101_v25 = vld [vmem:[%s2273_s2] sm:$0xff]  ;;  %s1097_s17 = ssub.s32 5, %s2001_s15  ;;  %s1234_s18 = sadd.s32 3, %s2001_s15 }
  0x1b   : > { %vm531_vm3 = vcmp.lt.s32.totalorder %v530_v26, %v2101_v25  ;;  %v500_v29 = vld [vmem:[%s2008_s22] sm:$0xff]  ;;  %vm667_vm4 = vcmp.lt.s32.totalorder %v666_v42, %v2101_v25  ;;  %s1371_s20 = ssub.s32 4, %s2001_s15 }
  0x1c   : > { %1813 = vmatpush3.bf16.msra.mxu0 %v2060_v13  ;;  %v532_v28 = vsel %vm531_vm3, 1, %v1934_v17  ;;  %v668_v46 = vsel %vm667_vm4, 1, %v1934_v17 }
  0x1d   : > { %1819 = vmatpush3.bf16.msra.mxu1 %v2064_v14  ;;  %1820 = vmatprep.subr.bf16.mxu0 %v1931_v4 }
  0x1e   : > { %1826 = vmatprep.subr.bf16.mxu1 %v1931_v4 }
  0x1f   : > { %1729 = vmatmul.mubr.msk.f32.vlgmr.msra.gmra.mrb[0].mxu0 %vm426_vm2, %v414_v15 }
  0x20   : > { %1740 = vmatmul.mubr.msk.f32.vlgmr.msra.gmra.mrb[0].mxu1 %vm426_vm2, %v550_v16  ;;  %1822 = vmatpush3.bf16.msra.mxu0 %v2035_v5 }
  0x21   : > { %1823 = vmatprep.subr.bf16.mxu0 %v1931_v4  ;;  %1828 = vmatpush3.bf16.msra.mxu1 %v2047_v9 }
  0x22   : > { %1750 = vmatprep.mubr.msk.f32.mxu0 %vm1932_vm1, %v1933_v10  ;;  %1829 = vmatprep.subr.bf16.mxu1 %v1931_v4 }
  0x23   : > { %1761 = vmatprep.mubr.msk.f32.mxu1 %vm1932_vm1, %v1933_v10 }
  0x24   : > { %1825 = vmatpush3.bf16.msra.mxu0 %v2060_v13 }
  0x25   : > { %1831 = vmatpush3.bf16.msra.mxu1 %v2064_v14  ;;  %1832 = vmatprep.subr.bf16.mxu0 %v1931_v4 }
  0x26   : > { %1838 = vmatprep.subr.bf16.mxu1 %v1931_v4 }
  0xf2   : > { %v496_v19 = vpop.f32.mrb[0].mxu0 }
  0xf3   : > { %v497_v21 = vadd.f32 %v2090_v18, %v496_v19  ;;  %v1730_v22 = vpop.f32.mrb[1].mxu0  ;;  %v631_v23 = vpop.f32.mrb[0].mxu1 }
  0xf4   : > { %v1741_v24 = vpop.f32.mrb[1].mxu1  ;;  %v632_v27 = vadd.f32 %v2095_v20, %v631_v23 }
  0xf5   : > { %509 = vrot.lane.b32.xlu0 %v497_v21, %s1935_s24  ;;  %v501_v30 = vadd.f32 %v500_v29, %v497_v21 }
  0xf6   : > { %v637_v33 = vadd.f32 %v1647_v31, %v632_v27 }
  0xf7   : > { %v1644_v32 = vmul.f32 -1.442695, %v501_v30 }
  0xf8   : > { %v1648_v34 = vmul.f32 -1.442695, %v637_v33 }
  0xf9   : > { %645 = vrot.lane.b32.xlu0 %v632_v27, %s1935_s24  ;;  %1874 = vpow2.f32 %v1644_v32  ;;  %v1652_v27 = vld [vmem:[%s2008_s22 + $0x8] sm:$0xff] }
  0xfa   : > { %1876 = vpow2.f32 %v1648_v34 }
  0xfd   : > { %534 = vperm.xlu0 %1872, %v532_v28  }
 0x101   : > { %525 = vrot.lane.b32.xlu0 %v414_v15, %s1936_s25 }
 0x103   : > { %v1875_v35 = vpop.eup %1874 }
 0x104   : > { %v505_v36 = vadd.f32 1.0, %v1875_v35  ;;  %v1877_v37 = vpop.eup %1876 }
 0x105   : > { %661 = vrot.lane.b32.xlu0 %v550_v16, %s1936_s25  ;;  %v641_v38 = vadd.f32 1.0, %v1877_v37  ;;  %v803_v37 = vstv %s686_s30 }
 0x106   : > { %1878 = vrcp.f32 %v505_v36  ;;  %vm804_vm7 = vcmp.lt.s32.totalorder %v803_v37, %v2101_v25  ;;  %v1214_v37 = vstv %s1097_s17 }
 0x107   : > { %1880 = vrcp.f32 %v641_v38  ;;  %vm1215_vm12 = vcmp.lt.s32.totalorder %v1214_v37, %v2101_v25 }
 0x110   : > { %v1879_v39 = vpop.eup %1878 }
 0x111   : > { %v1881_v43 = vpop.eup %1880  ;;  %v519_v56 = vsub.f32 1.0, %v1879_v39 }
 0x112   : > { %v655_v62 = vsub.f32 1.0, %v1881_v43 }
 0x167   : > { %v510_v40 = vpop.permute.xlu0 %509 }
 0x168   : > { %v512_v41 = vmul.f32 %v1879_v39, %v510_v40 }
 0x16a   : > { %514 = vrot.lane.b32.xlu1 %v512_v41, %s1935_s24  ;;  %v940_v41 = vstv %s823_s11 }
 0x16b   : > { %v646_v44 = vpop.permute.xlu0 %645  ;;  %vm941_vm8 = vcmp.lt.s32.totalorder %v940_v41, %v2101_v25 }
 0x16c   : > { %v648_v45 = vmul.f32 %v1881_v43, %v646_v44  ;;  %v805_v44 = vsel %vm804_vm7, 1, %v1934_v17 }
 0x16e   : > { %650 = vrot.lane.b32.xlu1 %v648_v45, %s1935_s24 }
 0x172   : > { %670 = vperm.xlu1 %1873, %v668_v46   ;;  %v942_v46 = vsel %vm941_vm8, 1, %v1934_v17 }
 0x17c   : > { %v535_v53 = vpop.permute.xlu0 %534 }
 0x17d   : > { %vm536_vm5 = vcmp.eq.s32.totalorder %v535_v53, 1 }
 0x180   : > { %v526_v55 = vpop.permute.xlu0 %525 }
 0x181   : > { %v528_v58 = vmul.f32 %v1879_v39, %v526_v55 }
 0x184   : > { %v662_v60 = vpop.permute.xlu0 %661 }
 0x185   : > { %v664_v0 = vmul.f32 %v1881_v43, %v662_v60 }
 0x1dc   : > { %v515_v47 = vpop.permute.xlu1 %514 }
 0x1dd   : > { %v517_v48 = vadd.f32 %v515_v47, %v500_v29  ;;  %v1657_v29 = vld [vmem:[%s2013_s26 + $0x10] sm:$0xff] }
 0x1df   : > { %1882 = vtanh.f32 %v517_v48 }
 0x1e0   : > { %v651_v49 = vpop.permute.xlu1 %650 }
 0x1e1   : > { %v653_v50 = vadd.f32 %v1647_v31, %v651_v49 }
 0x1e3   : > { %1884 = vtanh.f32 %v653_v50 }
 0x1e9   : > { %v1883_v51 = vpop.eup %1882 }
 0x1ea   : > { %521 = vrot.lane.b32.xlu1 %v1883_v51, %s1937_s28 }
 0x1ed   : > { %v1885_v52 = vpop.eup %1884 }
 0x1ee   : > { %657 = vrot.lane.b32.xlu1 %v1885_v52, %s1937_s28 }
 0x1f1   : > { %v671_v54 = vpop.permute.xlu1 %670 }
 0x1f2   : > { %vm672_vm6 = vcmp.eq.s32.totalorder %v671_v54, 1 }
 0x25c   : > { %v522_v57 = vpop.permute.xlu1 %521 }
 0x25d   : > { %v524_v59 = vmul.f32 %v522_v57, %v519_v56 }
 0x25f   : > { %v529_v61 = vadd.f32 %v528_v58, %v524_v59 }
 0x260   : > { %v658_v63 = vpop.permute.xlu1 %657 }
 0x261   : > { %v660_v1 = vmul.f32 %v658_v63, %v655_v62  ;;  %v537_v2 = vsel %vm536_vm5, %v529_v61, %v526_v55  ;;  %v2120_v3 = vsel %vm536_vm5, %v529_v61, 0.0 }
 0x262   : > { %539 = vrot.lane.b32.xlu1 %v537_v2, %s1937_s28 }
 0x263   : > { %v665_v6 = vadd.f32 %v664_v0, %v660_v1 }
 0x265   : > { %v673_v7 = vsel %vm672_vm6, %v665_v6, %v662_v60  ;;  %v2123_v8 = vsel %vm672_vm6, %v665_v6, 0.0 }
 0x266   : > { %675 = vrot.lane.b32.xlu0 %v673_v7, %s1937_s28 }
 0x2d4   : > { %v540_v11 = vpop.permute.xlu1 %539 }
 0x2d5   : > { %542 = vst.msk [vmem:[#allocation2] sm:$0xff] %vm426_vm2, %v540_v11 }
 0x2d8   : > { %v676_v12 = vpop.permute.xlu0 %675 }
 0x2d9   : > { %678 = vst.msk [vmem:[#allocation3] sm:$0xff] %vm426_vm2, %v676_v12 }
 0x2dc   : > { %v687_v15 = vld [vmem:[#allocation2] sm:$0xff] }
 0x2dd   : > { %1751 = vmatmul.mubr.msk.f32.vlgmr.msra.gmra.mrb[2].mxu0 %vm426_vm2, %v687_v15 }
 0x2de   : > { %1834 = vmatpush3.bf16.msra.mxu0 %v2035_v5  ;;  %1772 = vmatprep.mubr.msk.f32.mxu0 %vm1932_vm1, %v1933_v10 }
 0x2df   : > { %1835 = vmatprep.subr.bf16.mxu0 %v1931_v4 }
 0x2e0   : > { %v824_v16 = vld [vmem:[#allocation3] sm:$0xff] }
 0x2e1   : > { %1762 = vmatmul.mubr.msk.f32.vlgmr.msra.gmra.mrb[2].mxu1 %vm426_vm2, %v824_v16 }
 0x2e2   : > { %1837 = vmatpush3.bf16.msra.mxu0 %v2060_v13  ;;  %1840 = vmatpush3.bf16.msra.mxu1 %v2047_v9 }
 0x2e3   : > { %1841 = vmatprep.subr.bf16.mxu1 %v1931_v4  ;;  %1783 = vmatprep.mubr.msk.f32.mxu1 %vm1932_vm1, %v1933_v10 }
 0x2e4   : > { %1844 = vmatprep.subr.bf16.mxu0 %v1931_v4 }
 0x2e6   : > { %1843 = vmatpush3.bf16.msra.mxu1 %v2064_v14 }
 0x2e7   : > { %1850 = vmatprep.subr.bf16.mxu1 %v1931_v4 }
 0x3b0   : > { %v768_v19 = vpop.f32.mrb[2].mxu0 }
 0x3b1   : > { %v769_v21 = vadd.f32 %v2090_v18, %v768_v19  ;;  %v1752_v22 = vpop.f32.mrb[3].mxu0 }
 0x3b3   : > { %782 = vrot.lane.b32.xlu1 %v769_v21, %s1935_s24  ;;  %v774_v28 = vadd.f32 %v1652_v27, %v769_v21 }
 0x3b4   : > { %v905_v23 = vpop.f32.mrb[2].mxu1 }
 0x3b5   : > { %v906_v24 = vadd.f32 %v2095_v20, %v905_v23  ;;  %v1763_v26 = vpop.f32.mrb[3].mxu1  ;;  %v1653_v30 = vmul.f32 -1.442695, %v774_v28 }
 0x3b7   : > { %919 = vrot.lane.b32.xlu0 %v906_v24, %s1935_s24  ;;  %v911_v31 = vadd.f32 %v1657_v29, %v906_v24  ;;  %1886 = vpow2.f32 %v1653_v30 }
 0x3b9   : > { %v1658_v32 = vmul.f32 -1.442695, %v911_v31 }
 0x3bb   : > { %1888 = vpow2.f32 %v1658_v32 }
 0x3c1   : > { %v1887_v33 = vpop.eup %1886 }
 0x3c2   : > { %v778_v34 = vadd.f32 1.0, %v1887_v33  ;;  %v1077_v33 = vstv %s960_s16 }
 0x3c3   : > { %vm1078_vm11 = vcmp.lt.s32.totalorder %v1077_v33, %v2101_v25  ;;  %v1487_v33 = vstv %s1371_s20 }
 0x3c4   : > { %1890 = vrcp.f32 %v778_v34  ;;  %vm1488_vm0 = vcmp.lt.s32.totalorder %v1487_v33, %v2101_v25 }
 0x3c5   : > { %v1889_v35 = vpop.eup %1888 }
 0x3c6   : > { %v915_v36 = vadd.f32 1.0, %v1889_v35 }
 0x3c8   : > { %1892 = vrcp.f32 %v915_v36 }
 0x3ce   : > { %v1891_v38 = vpop.eup %1890 }
 0x3cf   : > { %v792_v56 = vsub.f32 1.0, %v1891_v38 }
 0x3d2   : > { %v1893_v42 = vpop.eup %1892 }
 0x3d3   : > { %v929_v62 = vsub.f32 1.0, %v1893_v42 }
 0x425   : > { %v783_v39 = vpop.permute.xlu1 %782 }
 0x426   : > { %v785_v40 = vmul.f32 %v1891_v38, %v783_v39 }
 0x428   : > { %787 = vrot.lane.b32.xlu1 %v785_v40, %s1935_s24  ;;  %v1079_v40 = vsel %vm1078_vm11, 1, %v1934_v17 }
 0x429   : > { %v920_v43 = vpop.permute.xlu0 %919 }
 0x42a   : > { %v922_v45 = vmul.f32 %v1893_v42, %v920_v43 }
 0x42c   : > { %807 = vperm.xlu1 %1873, %v805_v44   ;;  %924 = vrot.lane.b32.xlu0 %v922_v45, %s1935_s24 }
 0x430   : > { %944 = vperm.xlu0 %1872, %v942_v46  }
 0x434   : > { %798 = vrot.lane.b32.xlu0 %v687_v15, %s1936_s25 }
 0x438   : > { %935 = vrot.lane.b32.xlu0 %v824_v16, %s1936_s25 }
 0x49a   : > { %v788_v47 = vpop.permute.xlu1 %787 }
 0x49b   : > { %v790_v48 = vadd.f32 %v1652_v27, %v788_v47 }
 0x49d   : > { %1894 = vtanh.f32 %v790_v48 }
 0x49e   : > { %v925_v49 = vpop.permute.xlu0 %924 }
 0x49f   : > { %v927_v50 = vadd.f32 %v1657_v29, %v925_v49 }
 0x4a1   : > { %1896 = vtanh.f32 %v927_v50 }
 0x4a7   : > { %v1895_v51 = vpop.eup %1894 }
 0x4a8   : > { %794 = vrot.lane.b32.xlu1 %v1895_v51, %s1937_s28 }
 0x4ab   : > { %v1897_v52 = vpop.eup %1896  ;;  %v808_v54 = vpop.permute.xlu1 %807 }
 0x4ac   : > { %931 = vrot.lane.b32.xlu1 %v1897_v52, %s1937_s28  ;;  %vm809_vm9 = vcmp.eq.s32.totalorder %v808_v54, 1 }
 0x4af   : > { %v945_v53 = vpop.permute.xlu0 %944 }
 0x4b0   : > { %vm946_vm10 = vcmp.eq.s32.totalorder %v945_v53, 1 }
 0x4b3   : > { %v799_v55 = vpop.permute.xlu0 %798 }
 0x4b4   : > { %v801_v58 = vmul.f32 %v1891_v38, %v799_v55 }
 0x4b7   : > { %v936_v60 = vpop.permute.xlu0 %935 }
 0x4b8   : > { %v938_v0 = vmul.f32 %v1893_v42, %v936_v60  ;;  %v1216_v42 = vsel %vm1215_vm12, 1, %v1934_v17 }
 0x51a   : > { %v795_v57 = vpop.permute.xlu1 %794 }
 0x51b   : > { %v797_v59 = vmul.f32 %v795_v57, %v792_v56 }
 0x51d   : > { %v802_v61 = vadd.f32 %v801_v58, %v797_v59 }
 0x51e   : > { %v932_v63 = vpop.permute.xlu1 %931 }
 0x51f   : > { %v934_v1 = vmul.f32 %v932_v63, %v929_v62  ;;  %v810_v2 = vsel %vm809_vm9, %v802_v61, %v799_v55  ;;  %v2160_v6 = vsel %vm809_vm9, %v802_v61, 0.0 }
 0x520   : > { %812 = vrot.lane.b32.xlu1 %v810_v2, %s1937_s28 }
 0x521   : > { %v939_v7 = vadd.f32 %v938_v0, %v934_v1 }
 0x523   : > { %v947_v11 = vsel %vm946_vm10, %v939_v7, %v936_v60  ;;  %v2163_v12 = vsel %vm946_vm10, %v939_v7, 0.0 }
 0x524   : > { %949 = vrot.lane.b32.xlu0 %v947_v11, %s1937_s28 }
 0x592   : > { %v813_v15 = vpop.permute.xlu1 %812 }
 0x593   : > { %815 = vst.msk [vmem:[#allocation2] sm:$0xff] %vm426_vm2, %v813_v15 }
 0x596   : > { %v950_v16 = vpop.permute.xlu0 %949 }
 0x597   : > { %952 = vst.msk [vmem:[#allocation3] sm:$0xff] %vm426_vm2, %v950_v16 }
 0x59a   : > { %v961_v19 = vld [vmem:[#allocation2] sm:$0xff] }
 0x59b   : > { %1773 = vmatmul.mubr.msk.f32.vlgmr.msra.gmra.mrb[4].mxu0 %vm426_vm2, %v961_v19 }
 0x59c   : > { %1846 = vmatpush3.bf16.msra.mxu0 %v2035_v5  ;;  %1794 = vmatprep.mubr.msk.f32.mxu0 %vm1932_vm1, %v1933_v10 }
 0x59d   : > { %1847 = vmatprep.subr.bf16.mxu0 %v1931_v4 }
 0x59e   : > { %v1098_v21 = vld [vmem:[#allocation3] sm:$0xff] }
 0x59f   : > { %1784 = vmatmul.mubr.msk.f32.vlgmr.msra.gmra.mrb[4].mxu1 %vm426_vm2, %v1098_v21 }
 0x5a0   : > { %1849 = vmatpush3.bf16.msra.mxu0 %v2060_v13  ;;  %1852 = vmatpush3.bf16.msra.mxu1 %v2047_v9  ;;  %v1662_v9 = vld [vmem:[%s2008_s22 + $0x10] sm:$0xff]  ;;  %v1667_v13 = vld [vmem:[%s2013_s26 + $0x8] sm:$0xff] }
 0x5a1   : > { %1853 = vmatprep.subr.bf16.mxu1 %v1931_v4  ;;  %1805 = vmatprep.mubr.msk.f32.mxu1 %vm1932_vm1, %v1933_v10 }
 0x5a4   : > { %1855 = vmatpush3.bf16.msra.mxu1 %v2064_v14 }
 0x66e   : > { %v1042_v5 = vpop.f32.mrb[4].mxu0 }
 0x66f   : > { %v1043_v22 = vadd.f32 %v2090_v18, %v1042_v5  ;;  %v1774_v23 = vpop.f32.mrb[5].mxu0 }
 0x671   : > { %1056 = vrot.lane.b32.xlu1 %v1043_v22, %s1935_s24  ;;  %v1048_v4 = vadd.f32 %v1662_v9, %v1043_v22 }
 0x672   : > { %v1179_v24 = vpop.f32.mrb[4].mxu1 }
 0x673   : > { %v1180_v26 = vadd.f32 %v2095_v20, %v1179_v24  ;;  %v1785_v27 = vpop.f32.mrb[5].mxu1  ;;  %v1663_v10 = vmul.f32 -1.442695, %v1048_v4 }
 0x675   : > { %1193 = vrot.lane.b32.xlu0 %v1180_v26, %s1935_s24  ;;  %v1185_v28 = vadd.f32 %v1667_v13, %v1180_v26  ;;  %1898 = vpow2.f32 %v1663_v10  ;;  %v1672_v26 = vld [vmem:[%s2008_s22 + $0x18] sm:$0xff] }
 0x677   : > { %v1668_v14 = vmul.f32 -1.442695, %v1185_v28 }
 0x679   : > { %1900 = vpow2.f32 %v1668_v14 }
 0x67f   : > { %v1899_v29 = vpop.eup %1898 }
 0x680   : > { %v1052_v30 = vadd.f32 1.0, %v1899_v29 }
 0x682   : > { %1902 = vrcp.f32 %v1052_v30 }
 0x683   : > { %v1901_v31 = vpop.eup %1900 }
 0x684   : > { %v1189_v32 = vadd.f32 1.0, %v1901_v31 }
 0x686   : > { %1904 = vrcp.f32 %v1189_v32 }
 0x68c   : > { %v1903_v34 = vpop.eup %1902 }
 0x68d   : > { %v1066_v52 = vsub.f32 1.0, %v1903_v34 }
 0x690   : > { %v1905_v38 = vpop.eup %1904 }
 0x691   : > { %v1203_v58 = vsub.f32 1.0, %v1905_v38 }
 0x6e3   : > { %v1057_v35 = vpop.permute.xlu1 %1056 }
 0x6e4   : > { %v1059_v36 = vmul.f32 %v1903_v34, %v1057_v35 }
 0x6e6   : > { %1061 = vrot.lane.b32.xlu1 %v1059_v36, %s1935_s24 }
 0x6e7   : > { %v1194_v39 = vpop.permute.xlu0 %1193 }
 0x6e8   : > { %v1196_v41 = vmul.f32 %v1905_v38, %v1194_v39 }
 0x6ea   : > { %1081 = vperm.xlu1 %1873, %v1079_v40   ;;  %1198 = vrot.lane.b32.xlu0 %v1196_v41, %s1935_s24 }
 0x6ee   : > { %1218 = vperm.xlu0 %1872, %v1216_v42  }
 0x6f2   : > { %1072 = vrot.lane.b32.xlu0 %v961_v19, %s1936_s25 }
 0x6f6   : > { %1209 = vrot.lane.b32.xlu0 %v1098_v21, %s1936_s25 }
 0x758   : > { %v1062_v43 = vpop.permute.xlu1 %1061 }
 0x759   : > { %v1064_v44 = vadd.f32 %v1662_v9, %v1062_v43  ;;  %v1457_v9 = vld [vmem:[%s2013_s26] sm:$0xff] }
 0x75b   : > { %1906 = vtanh.f32 %v1064_v44 }
 0x75c   : > { %v1199_v45 = vpop.permute.xlu0 %1198 }
 0x75d   : > { %v1201_v46 = vadd.f32 %v1667_v13, %v1199_v45 }
 0x75f   : > { %1908 = vtanh.f32 %v1201_v46 }
 0x765   : > { %v1907_v47 = vpop.eup %1906 }
 0x766   : > { %1068 = vrot.lane.b32.xlu1 %v1907_v47, %s1937_s28 }
 0x769   : > { %v1909_v48 = vpop.eup %1908  ;;  %v1082_v50 = vpop.permute.xlu1 %1081 }
 0x76a   : > { %1205 = vrot.lane.b32.xlu1 %v1909_v48, %s1937_s28  ;;  %vm1083_vm13 = vcmp.eq.s32.totalorder %v1082_v50, 1 }
 0x76d   : > { %v1219_v49 = vpop.permute.xlu0 %1218 }
 0x76e   : > { %vm1220_vm14 = vcmp.eq.s32.totalorder %v1219_v49, 1 }
 0x771   : > { %v1073_v51 = vpop.permute.xlu0 %1072 }
 0x772   : > { %v1075_v54 = vmul.f32 %v1903_v34, %v1073_v51 }
 0x775   : > { %v1210_v56 = vpop.permute.xlu0 %1209 }
 0x776   : > { %v1212_v60 = vmul.f32 %v1905_v38, %v1210_v56  ;;  %v1489_v38 = vsel %vm1488_vm0, 1, %v1934_v17 }
 0x7d8   : > { %v1069_v53 = vpop.permute.xlu1 %1068 }
 0x7d9   : > { %v1071_v55 = vmul.f32 %v1069_v53, %v1066_v52 }
 0x7db   : > { %v1076_v57 = vadd.f32 %v1075_v54, %v1071_v55 }
 0x7dc   : > { %v1206_v59 = vpop.permute.xlu1 %1205 }
 0x7dd   : > { %v1208_v61 = vmul.f32 %v1206_v59, %v1203_v58  ;;  %v1084_v62 = vsel %vm1083_vm13, %v1076_v57, %v1073_v51  ;;  %v2198_v63 = vsel %vm1083_vm13, %v1076_v57, 0.0 }
 0x7de   : > { %1086 = vrot.lane.b32.xlu1 %v1084_v62, %s1937_s28 }
 0x7df   : > { %v1213_v0 = vadd.f32 %v1212_v60, %v1208_v61 }
 0x7e1   : > { %v1221_v1 = vsel %vm1220_vm14, %v1213_v0, %v1210_v56  ;;  %v2201_v2 = vsel %vm1220_vm14, %v1213_v0, 0.0 }
 0x7e2   : > { %1223 = vrot.lane.b32.xlu0 %v1221_v1, %s1937_s28 }
 0x850   : > { %v1087_v7 = vpop.permute.xlu1 %1086 }
 0x851   : > { %1089 = vst.msk [vmem:[#allocation2] sm:$0xff] %vm426_vm2, %v1087_v7 }
 0x854   : > { %v1224_v11 = vpop.permute.xlu0 %1223 }
 0x855   : > { %1226 = vst.msk [vmem:[#allocation3] sm:$0xff] %vm426_vm2, %v1224_v11 }
 0x858   : > { %v1235_v15 = vld [vmem:[#allocation2] sm:$0xff] }
 0x859   : > { %1795 = vmatmul.mubr.msk.f32.vlgmr.msra.gmra.mrb[6].mxu0 %vm426_vm2, %v1235_v15 }
 0x85c   : > { %v1372_v16 = vld [vmem:[#allocation3] sm:$0xff] }
 0x85d   : > { %1806 = vmatmul.mubr.msk.f32.vlgmr.msra.gmra.mrb[6].mxu1 %vm426_vm2, %v1372_v16 }
 0x92c   : > { %v1316_v19 = vpop.f32.mrb[6].mxu0 }
 0x92d   : > { %v1317_v21 = vadd.f32 %v2090_v18, %v1316_v19  ;;  %v1796_v5 = vpop.f32.mrb[7].mxu0 }
 0x92f   : > { %1330 = vrot.lane.b32.xlu1 %v1317_v21, %s1935_s24  ;;  %v1322_v27 = vadd.f32 %v1672_v26, %v1317_v21 }
 0x930   : > { %v1453_v22 = vpop.f32.mrb[6].mxu1 }
 0x931   : > { %v1454_v23 = vadd.f32 %v2095_v20, %v1453_v22  ;;  %v1807_v24 = vpop.f32.mrb[7].mxu1  ;;  %v1673_v4 = vmul.f32 -1.442695, %v1322_v27  ;;  %v1351_v20 = vstv %s1234_s18 }
 0x932   : > { %vm1352_vm15 = vcmp.lt.s32.totalorder %v1351_v20, %v2101_v25 }
 0x933   : > { %1466 = vrot.lane.b32.xlu0 %v1454_v23, %s1935_s24  ;;  %v1458_v13 = vadd.f32 %v1457_v9, %v1454_v23  ;;  %1910 = vpow2.f32 %v1673_v4  ;;  %v1353_v36 = vsel %vm1352_vm15, 1, %v1934_v17 }
 0x935   : > { %v1677_v10 = vmul.f32 -1.442695, %v1458_v13 }
 0x937   : > { %1912 = vpow2.f32 %v1677_v10 }
 0x93d   : > { %v1911_v18 = vpop.eup %1910 }
 0x93e   : > { %v1326_v28 = vadd.f32 1.0, %v1911_v18 }
 0x940   : > { %1914 = vrcp.f32 %v1326_v28 }
 0x941   : > { %v1913_v14 = vpop.eup %1912 }
 0x942   : > { %v1462_v29 = vadd.f32 1.0, %v1913_v14 }
 0x944   : > { %1916 = vrcp.f32 %v1462_v29 }
 0x94a   : > { %v1915_v30 = vpop.eup %1914 }
 0x94b   : > { %v1340_v47 = vsub.f32 1.0, %v1915_v30 }
 0x94e   : > { %v1917_v34 = vpop.eup %1916 }
 0x9a1   : > { %v1331_v31 = vpop.permute.xlu1 %1330 }
 0x9a2   : > { %v1333_v32 = vmul.f32 %v1915_v30, %v1331_v31 }
 0x9a4   : > { %1335 = vrot.lane.b32.xlu1 %v1333_v32, %s1935_s24 }
 0x9a5   : > { %v1467_v35 = vpop.permute.xlu0 %1466 }
 0x9a6   : > { %v1469_v37 = vmul.f32 %v1917_v34, %v1467_v35 }
 0x9a8   : > { %1355 = vperm.xlu1 %1873, %v1353_v36   ;;  %1471 = vrot.lane.b32.xlu0 %v1469_v37, %s1935_s24 }
 0x9ac   : > { %1491 = vperm.xlu0 %1872, %v1489_v38  }
 0x9b0   : > { %1346 = vrot.lane.b32.xlu0 %v1235_v15, %s1936_s25 }
 0x9b4   : > { %1482 = vrot.lane.b32.xlu0 %v1372_v16, %s1936_s25 }
 0x9b8   : > { %681 = vrot.lane.b32.xlu0 %v2123_v8, %s1937_s28 }
 0x9bc   : > { %955 = vrot.lane.b32.xlu0 %v2163_v12, %s1937_s28 }
 0xa16   : > { %v1336_v39 = vpop.permute.xlu1 %1335 }
 0xa17   : > { %v1338_v40 = vadd.f32 %v1672_v26, %v1336_v39 }
 0xa19   : > { %1918 = vtanh.f32 %v1338_v40 }
 0xa1a   : > { %v1472_v25 = vpop.permute.xlu0 %1471 }
 0xa1b   : > { %v1474_v41 = vadd.f32 %v1472_v25, %v1457_v9 }
 0xa1d   : > { %1920 = vtanh.f32 %v1474_v41 }
 0xa23   : > { %v1919_v17 = vpop.eup %1918 }
 0xa24   : > { %1342 = vrot.lane.b32.xlu1 %v1919_v17, %s1937_s28 }
 0xa27   : > { %v1921_v42 = vpop.eup %1920  ;;  %v1356_v46 = vpop.permute.xlu1 %1355 }
 0xa28   : > { %1478 = vrot.lane.b32.xlu1 %v1921_v42, %s1937_s28  ;;  %vm1357_vm1 = vcmp.eq.s32.totalorder %v1356_v46, 1 }
 0xa2b   : > { %v1492_v43 = vpop.permute.xlu0 %1491 }
 0xa2c   : > { %545 = vrot.lane.b32.xlu1 %v2120_v3, %s1937_s28  ;;  %v1476_v3 = vsub.f32 1.0, %v1917_v34  ;;  %vm1493_vm3 = vcmp.eq.s32.totalorder %v1492_v43, 1 }
 0xa2f   : > { %v1347_v8 = vpop.permute.xlu0 %1346 }
 0xa30   : > { %818 = vrot.lane.b32.xlu1 %v2160_v6, %s1937_s28  ;;  %v1349_v49 = vmul.f32 %v1915_v30, %v1347_v8 }
 0xa33   : > { %v1483_v12 = vpop.permute.xlu0 %1482 }
 0xa34   : > { %v1485_v53 = vmul.f32 %v1917_v34, %v1483_v12 }
 0xa37   : > { %v682_v44 = vpop.permute.xlu0 %681 }
 0xa38   : > { %1649 = vst.msk [vmem:[%s2023_s12 + $0x18] sm:$0xff] %vm426_vm2, %v682_v44 }
 0xa3b   : > { %v956_v45 = vpop.permute.xlu0 %955 }
 0xa3c   : > { %1659 = vst.msk [vmem:[%s2023_s12 + $0x10] sm:$0xff] %vm426_vm2, %v956_v45 }
 0xa96   : > { %v1343_v48 = vpop.permute.xlu1 %1342 }
 0xa97   : > { %v1345_v50 = vmul.f32 %v1343_v48, %v1340_v47 }
 0xa99   : > { %v1350_v51 = vadd.f32 %v1349_v49, %v1345_v50 }
 0xa9a   : > { %v1479_v52 = vpop.permute.xlu1 %1478 }
 0xa9b   : > { %v1481_v6 = vmul.f32 %v1479_v52, %v1476_v3  ;;  %v1358_v54 = vsel %vm1357_vm1, %v1350_v51, %v1347_v8  ;;  %v1364_v59 = vsel %vm1357_vm1, %v1350_v51, 0.0 }
 0xa9c   : > { %1360 = vrot.lane.b32.xlu1 %v1358_v54, %s1937_s28 }
 0xa9d   : > { %v1486_v55 = vadd.f32 %v1485_v53, %v1481_v6 }
 0xa9e   : > { %v546_v56 = vpop.permute.xlu1 %545 }
 0xa9f   : > { %548 = vst.msk [vmem:[%s2018_s29] sm:$0xff] %vm426_vm2, %v546_v56  ;;  %v1494_v57 = vsel %vm1493_vm3, %v1486_v55, %v1483_v12  ;;  %v1500_v60 = vsel %vm1493_vm3, %v1486_v55, 0.0 }
 0xaa0   : > { %1092 = vrot.lane.b32.xlu1 %v2198_v63, %s1937_s28  ;;  %1496 = vrot.lane.b32.xlu0 %v1494_v57, %s1937_s28 }
 0xaa2   : > { %v819_v58 = vpop.permute.xlu1 %818 }
 0xaa3   : > { %1654 = vst.msk [vmem:[%s2018_s29 + $0x8] sm:$0xff] %vm426_vm2, %v819_v58 }
 0xaa4   : > { %1366 = vrot.lane.b32.xlu1 %v1364_v59, %s1937_s28  ;;  %1229 = vrot.lane.b32.xlu0 %v2201_v2, %s1937_s28 }
 0xaa8   : > { %1502 = vrot.lane.b32.xlu0 %v1500_v60, %s1937_s28 }
 0xb0e   : > { %v1361_v61 = vpop.permute.xlu1 %1360 }
 0xb0f   : > { %1363 = vst.msk [vmem:[#allocation2] sm:$0xff] %vm426_vm2, %v1361_v61 }
 0xb12   : > { %v1093_v62 = vpop.permute.xlu1 %1092  ;;  %v1497_v63 = vpop.permute.xlu0 %1496 }
 0xb13   : > { %1664 = vst.msk [vmem:[%s2018_s29 + $0x10] sm:$0xff] %vm426_vm2, %v1093_v62  ;;  %1499 = vst.msk [vmem:[#allocation3] sm:$0xff] %vm426_vm2, %v1497_v63 }
 0xb16   : > { %v1506_v0 = vld [vmem:[#allocation2] sm:$0xff]  ;;  %v1367_v1 = vpop.permute.xlu1 %1366  ;;  %v1230_v7 = vpop.permute.xlu0 %1229 }
 0xb17   : > { %1507 = vst.msk [vmem:[%s2280_s9] sm:$0xff] %vm426_vm2, %v1506_v0  ;;  %1674 = vst.msk [vmem:[%s2018_s29 + $0x18] sm:$0xff] %vm426_vm2, %v1367_v1 }
 0xb18   : > { %1669 = vst.msk [vmem:[%s2023_s12 + $0x8] sm:$0xff] %vm426_vm2, %v1230_v7 }
 0xb1a   : > { %v1508_v2 = vld [vmem:[#allocation3] sm:$0xff]  ;;  %v1503_v11 = vpop.permute.xlu0 %1502 }
 0xb1b   : > { %1509 = vst.msk [vmem:[%s2281_s10] sm:$0xff] %vm426_vm2, %v1508_v2  ;;  %1505 = vst.msk [vmem:[%s2023_s12] sm:$0xff] %vm426_vm2, %v1503_v11 }
 0xb1c PF: > { %s21_s13 = sadd.s32 1, %s1928_s13  }
 0xb1d   : > { %p18_p6 = scmp.ge.s32.totalorder %s21_s13, 4  }
 0xb1f   :  { %20 = sbr.rel (!%p18_p6) target bundleno = 1 (0x1), region = 125 }

</bundles_post_ra>
